<compile_context>
chip_gen: v6e
topology: v6e:2x2x1
jax: 0.10.0
libtpu: 0.0.40
codegen_flags: <defaults>
</compile_context>

<pallas_src>
import jax
import jax.numpy as jnp
from jax import lax
from jax.experimental import pallas as pl
from jax.experimental.pallas import tpu as pltpu

_NEG_BIG = -1e30                       # bias on padded vocab rows -> exp() underflows to 0
_GATHER_ROWS = 32                      # embedding rows gathered per grid step
_FUSED_VMEM_BUDGET = 24 * 1024 * 1024  # use the fused kernel below this footprint
_VMEM_LIMIT = 48 * 1024 * 1024         # scoped VMEM limit (safe on v5e/v6e/v7x)


# ---------------- fused kernel: emb lookup + linear + CE (small vocab) -------
def _mlm_fused_kernel(ids_ref, y_ref, emb_ref, w_ref, b_ref, loss_ref):
    """One token chunk, full vocab; tables stay VMEM-resident across the grid.

    ids_ref : (T_BLK, 1)  int32   corrupted token ids (column -> sublane axis)
    y_ref   : (1, T_BLK)  int32   target ids (row -> lane axis)
    emb_ref : (V_PAD, D)  bf16    embedding table (constant index_map)
    w_ref   : (V_PAD, D)  bf16    linear weight   (constant index_map)
    b_ref   : (V_PAD, 1)  f32     linear bias, _NEG_BIG on padded rows
    loss_ref: (1, T_BLK)  f32     per-token CE loss
    """
    v_pad, _ = w_ref.shape
    t_blk = ids_ref.shape[0]

    # Embedding lookup as a one-hot matmul on the MXU (table never leaves VMEM).
    vocab_lane = lax.broadcasted_iota(jnp.int32, (t_blk, v_pad), 1)
    one_hot = (ids_ref[...] == vocab_lane).astype(jnp.bfloat16)        # (T_BLK, V_PAD)
    e = lax.dot_general(one_hot, emb_ref[...],
                        dimension_numbers=(((1,), (0,)), ((), ())),
                        preferred_element_type=jnp.float32)            # (T_BLK, D)
    e_bf = e.astype(jnp.bfloat16)          # exact: each row is one bf16 table row

    # Logits in (V_PAD, T_BLK) layout: reductions over sublanes, lane-dense loss.
    logits = lax.dot_general(w_ref[...], e_bf,
                             dimension_numbers=(((1,), (1,)), ((), ())),
                             preferred_element_type=jnp.float32) + b_ref[...]

    vocab_sub = lax.broadcasted_iota(jnp.int32, (v_pad, t_blk), 0)
    tgt = jnp.sum(jnp.where(vocab_sub == y_ref[...], logits, 0.0),
                  axis=0, keepdims=True)                               # (1, T_BLK)

    m = jnp.max(logits, axis=0, keepdims=True)
    lse = m + jnp.log(jnp.sum(jnp.exp(logits - m), axis=0, keepdims=True))
    loss_ref[...] = lse - tgt


# ---------------- Pallas gather kernel (large-vocab fallback path) -----------
def _embed_gather_kernel(ids_ref, *refs):
    del ids_ref                                  # only used by the index_maps
    row_refs = refs[:_GATHER_ROWS]               # _GATHER_ROWS x (1, D) f32 rows
    out_ref = refs[_GATHER_ROWS]                 # (_GATHER_ROWS, D) bf16
    out_ref[...] = jnp.concatenate(
        [r[...] for r in row_refs], axis=0).astype(out_ref.dtype)


def embedding_gather(ids, table):
    """table[ids] -> bf16 (N, D), via scalar-prefetched ids + row BlockSpecs.

    ids   : (N,) int32, N % _GATHER_ROWS == 0
    table : (V, D) float32
    Only the N needed rows move through HBM; the bf16 cast happens in-kernel so
    the writeback is half-width and no separate XLA cast pass is needed.
    """
    (N,) = ids.shape
    _, D = table.shape
    assert N % _GATHER_ROWS == 0

    def row_map(k):
        # block size along the vocab dim is 1 -> block index == row index
        return lambda i, ids_ref: (ids_ref[i * _GATHER_ROWS + k], 0)

    # TODO(synk): pipeline_mode=pl.Buffered(3) on the row specs would hide more
    # tiny-DMA latency; left at default double-buffering for robustness.
    return pl.pallas_call(
        _embed_gather_kernel,
        out_shape=jax.ShapeDtypeStruct((N, D), jnp.bfloat16),
        grid_spec=pltpu.PrefetchScalarGridSpec(
            num_scalar_prefetch=1,
            grid=(N // _GATHER_ROWS,),
            in_specs=[pl.BlockSpec((1, D), row_map(k)) for k in range(_GATHER_ROWS)],
            out_specs=pl.BlockSpec((_GATHER_ROWS, D), lambda i, ids_ref: (i, 0)),
        ),
        compiler_params=pltpu.CompilerParams(
            dimension_semantics=("parallel",)),
    )(ids, *([table] * _GATHER_ROWS))


# ---------------- V-tiled online-LSE CE kernel (large-vocab fallback) --------
def _mlm_ce_tiled_kernel(t_ref, e_ref, w_ref, b_ref, loss_ref, m_sc, l_sc):
    """One grid step: one token chunk x one vocab tile (online log-sum-exp).

    t_ref   : (1, T_BLK)   f32   precomputed target logits (e . w[y] + b[y])
    e_ref   : (T_BLK, D)   bf16  gathered embeddings
    w_ref   : (V_TILE, D)  bf16  weight tile
    b_ref   : (V_TILE, 1)  f32   bias tile, _NEG_BIG on padded rows
    loss_ref: (1, T_BLK)   f32   per-token loss (written on the last vocab tile)
    """
    vi = pl.program_id(1)

    @pl.when(vi == 0)
    def _():
        m_sc[...] = jnp.full_like(m_sc, _NEG_BIG)
        l_sc[...] = jnp.zeros_like(l_sc)

    logits = lax.dot_general(w_ref[...], e_ref[...],
                             dimension_numbers=(((1,), (1,)), ((), ())),
                             preferred_element_type=jnp.float32) + b_ref[...]

    m_new = jnp.maximum(m_sc[...], jnp.max(logits, axis=0, keepdims=True))
    l_sc[...] = (l_sc[...] * jnp.exp(m_sc[...] - m_new)
                 + jnp.sum(jnp.exp(logits - m_new), axis=0, keepdims=True))
    m_sc[...] = m_new

    @pl.when(vi == pl.num_programs(1) - 1)
    def _():
        loss_ref[...] = m_sc[...] + jnp.log(l_sc[...]) - t_ref[...]


# ---------------- parameter prep (done once, not per forward) ----------------
def prepare_mlm_params(emb, w, b):
    """Pad/cast the model parameters once at init time."""
    V, D = emb.shape
    assert w.shape == (V, D) and b.shape == (V,)
    v_pad = int(pl.cdiv(V, 128)) * 128
    pad2 = ((0, v_pad - V), (0, 0))
    return dict(
        V=V, D=D, v_pad=v_pad,
        emb=emb.astype(jnp.float32),
        w=w.astype(jnp.float32),
        b=b.astype(jnp.float32),
        emb_pad_bf=jnp.pad(emb.astype(jnp.float32), pad2).astype(jnp.bfloat16),
        w_pad_bf=jnp.pad(w.astype(jnp.float32), pad2).astype(jnp.bfloat16),
        b_col=jnp.pad(b.astype(jnp.float32), (0, v_pad - V),
                      constant_values=_NEG_BIG).reshape(v_pad, 1),
    )


# ---------------- per-token loss dispatcher ----------------------------------
def mlm_per_token_loss(masked_x, y, params, *, t_blk=512, v_tile=None,
                       force_tiled=False):
    """Per-token CE loss of linear(emb(masked_x)) vs y, flattened (B*T,) f32."""
    B, T = masked_x.shape
    D, v_pad = params["D"], params["v_pad"]
    assert t_blk % 128 == 0
    N = B * T
    n_pad = int(pl.cdiv(N, t_blk)) * t_blk
    n_chunks = n_pad // t_blk

    ids = jnp.pad(masked_x.reshape(-1).astype(jnp.int32), (0, n_pad - N))
    yf = jnp.pad(y.reshape(-1).astype(jnp.int32), (0, n_pad - N))

    # Footprint of keeping both tables + per-chunk logits temporaries in VMEM.
    fused_bytes = 2 * v_pad * D * 2 + v_pad * 4 + 4 * v_pad * t_blk * 4
    if (not force_tiled) and fused_bytes <= _FUSED_VMEM_BUDGET:
        # ---- fused path: one kernel, tables VMEM-resident across the grid ---
        per_tok = pl.pallas_call(
            _mlm_fused_kernel,
            out_shape=jax.ShapeDtypeStruct((1, n_pad), jnp.float32),
            grid_spec=pltpu.PrefetchScalarGridSpec(
                num_scalar_prefetch=0,
                grid=(n_chunks,),
                in_specs=[
                    pl.BlockSpec((t_blk, 1), lambda ti: (ti, 0)),   # ids column
                    pl.BlockSpec((1, t_blk), lambda ti: (0, ti)),   # targets row
                    pl.BlockSpec((v_pad, D), lambda ti: (0, 0)),    # emb (resident)
                    pl.BlockSpec((v_pad, D), lambda ti: (0, 0)),    # weight (resident)
                    pl.BlockSpec((v_pad, 1), lambda ti: (0, 0)),    # bias (resident)
                ],
                out_specs=pl.BlockSpec((1, t_blk), lambda ti: (0, ti)),
            ),
            compiler_params=pltpu.CompilerParams(
                dimension_semantics=("parallel",),
                vmem_limit_bytes=_VMEM_LIMIT),
        )(ids.reshape(n_pad, 1), yf.reshape(1, n_pad),
          params["emb_pad_bf"], params["w_pad_bf"], params["b_col"])
        return per_tok[0, :N]

    # ---- tiled fallback (large vocab): gather + V-tiled online-LSE kernel ---
    if v_tile is None:
        if v_pad * D * 2 <= (8 << 20):   # whole weight fits -> single vocab tile,
            v_tile = v_pad               # fetched from HBM exactly once.
        else:
            v_tile = next(t for t in (2048, 1024, 512, 256, 128)
                          if v_pad % t == 0)
    assert v_pad % v_tile == 0 and v_tile % 8 == 0

    e_bf = embedding_gather(ids, params["emb"])     # (n_pad, D) bf16
    wy_bf = embedding_gather(yf, params["w"])       # (n_pad, D) bf16

    # Target logit computed once per token, OUTSIDE the vocab loop.
    tgt = (jnp.sum(e_bf.astype(jnp.float32) * wy_bf.astype(jnp.float32), axis=-1)
           + params["b"][yf]).reshape(1, n_pad)

    grid = (n_chunks, v_pad // v_tile)              # (token chunks, vocab tiles)
    per_tok = pl.pallas_call(
        _mlm_ce_tiled_kernel,
        out_shape=jax.ShapeDtypeStruct((1, n_pad), jnp.float32),
        grid_spec=pltpu.PrefetchScalarGridSpec(
            num_scalar_prefetch=0,
            grid=grid,
            in_specs=[
                pl.BlockSpec((1, t_blk), lambda ti, vi: (0, ti)),    # target logit
                pl.BlockSpec((t_blk, D), lambda ti, vi: (ti, 0)),    # emb chunk
                pl.BlockSpec((v_tile, D), lambda ti, vi: (vi, 0)),   # weight tile
                pl.BlockSpec((v_tile, 1), lambda ti, vi: (vi, 0)),   # bias tile
            ],
            out_specs=pl.BlockSpec((1, t_blk), lambda ti, vi: (0, ti)),
            scratch_shapes=[
                pltpu.VMEM((1, t_blk), jnp.float32),   # running max
                pltpu.VMEM((1, t_blk), jnp.float32),   # running sum(exp)
            ],
        ),
        compiler_params=pltpu.CompilerParams(
            dimension_semantics=("parallel", "arbitrary"),
            vmem_limit_bytes=_VMEM_LIMIT),
    )(tgt, e_bf, params["w_pad_bf"], params["b_col"])
    return per_tok[0, :N]


# ---------------- MLM forward (glue) -----------------------------------------
def mlm_forward(key, X, y, params, *, mask_prob=0.15, replace_prob=0.9,
                random_prob=0.2, pad_token_id=0, mask_token_id=1,
                ignore_token_ids=(), num_tokens=None,
                t_blk=512, v_tile=None, force_tiled=False):
    """Reproduces MLM.forward: random corruption, model forward, mean CE."""
    assert num_tokens is not None
    k1, k2, k3, k4 = jax.random.split(key, 4)

    def ignore_mask(t):
        m = jnp.zeros_like(t, dtype=bool)
        for tok in ignore_token_ids:
            m = m | (t == tok)
        return m

    all_no_mask = ignore_mask(X)
    all_mask = (jax.random.uniform(k1, X.shape) < mask_prob) & (~all_no_mask)
    y_filled = jnp.where(all_mask, y, pad_token_id)      # y.masked_fill_(~all_mask, pad)

    random_mask = (jax.random.uniform(k2, X.shape) < random_prob) & (~all_no_mask)
    random_tokens = jax.random.randint(k3, X.shape, 0, num_tokens, dtype=X.dtype)
    masked_X = jnp.where(random_mask, random_tokens, X)

    # [MASK] replacement is gated on random_mask (masking_mask * random_mask),
    # exactly as in the reference MLM.forward.
    masking_mask = (jax.random.uniform(k4, X.shape) < replace_prob) & random_mask
    masked_X = jnp.where(masking_mask, jnp.asarray(mask_token_id, X.dtype), masked_X)

    per_tok = mlm_per_token_loss(masked_X, y_filled, params, t_blk=t_blk,
                                 v_tile=v_tile, force_tiled=force_tiled)
    # F.cross_entropy default reduction='mean' over all B*T positions
    # (unmasked positions contribute CE against pad_token_id, as in the spec).
    return jnp.mean(per_tok), masked_X, y_filled


# Pure-JAX reference (same bf16 matmul operands, f32 accumulation) for a check.
def _reference_loss(masked_X, y_filled, emb, w, b):
    e = emb[masked_X].astype(jnp.bfloat16)                         # (B, T, D)
    logits = jnp.einsum("btd,vd->btv", e, w.astype(jnp.bfloat16),
                        preferred_element_type=jnp.float32) + b    # (B, T, V)
    lse = jax.nn.logsumexp(logits, axis=-1)
    tgt = jnp.take_along_axis(logits, y_filled[..., None], axis=-1)[..., 0]
    return jnp.mean(lse - tgt)


if __name__ == "__main__":
    # Small shapes consistent with the module (char-level vocab, scaled n_embd).
    B, T = 4, 120            # pads to 512 tokens
    V, D = 100, 128          # vocab_size, n_embd (scaled down from 384)

    root = jax.random.PRNGKey(0)
    k_emb, k_w, k_b, k_x, k_y, k_mask = jax.random.split(root, 6)

    emb = jax.random.normal(k_emb, (V, D), dtype=jnp.float32) * 0.02
    w = jax.random.normal(k_w, (V, D), dtype=jnp.float32) * 0.02
    b = jax.random.normal(k_b, (V,), dtype=jnp.float32) * 0.02

    X = jax.random.randint(k_x, (B, T), 2, V, dtype=jnp.int32)   # avoid pad/mask ids
    y = jax.random.randint(k_y, (B, T), 2, V, dtype=jnp.int32)

    params = prepare_mlm_params(emb, w, b)

    # Fused path (tables VMEM-resident, single kernel); t_blk=256 -> 2 token chunks.
    loss_fused, masked_X, y_filled = mlm_forward(
        k_mask, X, y, params, num_tokens=V, t_blk=256)
    loss_fused = jax.block_until_ready(loss_fused)

    ref = _reference_loss(masked_X, y_filled, emb, w, b)
    assert jnp.isfinite(loss_fused), loss_fused
    assert jnp.allclose(loss_fused, ref, rtol=2e-4, atol=2e-4), (loss_fused, ref)

    # Tiled fallback (gather kernel + V-tiled online-LSE CE), forced for coverage:
    # 2 token chunks x 2 vocab tiles, exercising token and vocab padding paths.
    loss_tiled, _, _ = mlm_forward(
        k_mask, X, y, params, num_tokens=V, t_blk=256, v_tile=64, force_tiled=True)
    loss_tiled = jax.block_until_ready(loss_tiled)
    assert jnp.allclose(loss_tiled, ref, rtol=2e-4, atol=2e-4), (loss_tiled, ref)

    print("KERNEL_OK")
</pallas_src>

<mosaic_0001>
module attributes {stable_mosaic.version = 11 : i64} {
  func.func @_mlm_fused_kernel(%arg0: i32, %arg1: memref<256x1xi32, #tpu.memory_space<vmem>>, %arg2: memref<1x256xi32, #tpu.memory_space<vmem>>, %arg3: memref<128x128xbf16, #tpu.memory_space<vmem>>, %arg4: memref<128x128xbf16, #tpu.memory_space<vmem>>, %arg5: memref<128x1xf32, #tpu.memory_space<vmem>>, %arg6: memref<1x256xf32, #tpu.memory_space<vmem>>) attributes {dimension_semantics = [#tpu.dimension_semantics<parallel>], iteration_bounds = array<i64: 2>, scalar_prefetch = 0 : i64, scratch_operands = 0 : i64, tpu.core_type = #tpu.core_type<tc>, window_params = [{transform_indices = @transform_0, window_bounds = array<i64: 256, 1>}, {transform_indices = @transform_1, window_bounds = array<i64: 1, 256>}, {pipeline_mode = #tpu.pipeline_mode<synchronous>, transform_indices = @transform_2, window_bounds = array<i64: 128, 128>}, {pipeline_mode = #tpu.pipeline_mode<synchronous>, transform_indices = @transform_3, window_bounds = array<i64: 128, 128>}, {pipeline_mode = #tpu.pipeline_mode<synchronous>, transform_indices = @transform_4, window_bounds = array<i64: 128, 1>}, {transform_indices = @transform_5, window_bounds = array<i64: 1, 256>}]} {
    %0 = tpu.iota {dimensions = array<i32: 1>} : vector<256x128xi32>
    %c0 = arith.constant 0 : index
    %c0_0 = arith.constant 0 : index
    %1 = vector.load %arg1[%c0, %c0_0] : memref<256x1xi32, #tpu.memory_space<vmem>>, vector<256x1xi32>
    %2 = vector.broadcast %1 : vector<256x1xi32> to vector<256x128xi32>
    %3 = arith.cmpi eq, %2, %0 : vector<256x128xi32>
    %4 = arith.extui %3 : vector<256x128xi1> to vector<256x128xi32>
    %5 = arith.sitofp %4 : vector<256x128xi32> to vector<256x128xf32>
    %6 = arith.truncf %5 : vector<256x128xf32> to vector<256x128xbf16>
    %c0_1 = arith.constant 0 : index
    %c0_2 = arith.constant 0 : index
    %7 = vector.load %arg3[%c0_1, %c0_2] : memref<128x128xbf16, #tpu.memory_space<vmem>>, vector<128x128xbf16>
    %cst = arith.constant dense<0.000000e+00> : vector<256x128xf32>
    %8 = tpu.matmul %6, %7, %cst {dimension_numbers = #tpu.dot_dimension_numbers<[1], [0], [0], [1], [0, 0, 1, 1], [], []>} : vector<256x128xbf16>, vector<128x128xbf16>, vector<256x128xf32> -> vector<256x128xf32>
    %9 = arith.truncf %8 : vector<256x128xf32> to vector<256x128xbf16>
    %c0_3 = arith.constant 0 : index
    %c0_4 = arith.constant 0 : index
    %10 = vector.load %arg4[%c0_3, %c0_4] : memref<128x128xbf16, #tpu.memory_space<vmem>>, vector<128x128xbf16>
    %cst_5 = arith.constant dense<0.000000e+00> : vector<128x256xf32>
    %11 = tpu.matmul %10, %9, %cst_5 {dimension_numbers = #tpu.dot_dimension_numbers<[1], [1], [0], [0], [0, 0, 1, 0], [], []>} : vector<128x128xbf16>, vector<256x128xbf16>, vector<128x256xf32> -> vector<128x256xf32>
    %c0_6 = arith.constant 0 : index
    %c0_7 = arith.constant 0 : index
    %12 = vector.load %arg5[%c0_6, %c0_7] : memref<128x1xf32, #tpu.memory_space<vmem>>, vector<128x1xf32>
    %13 = vector.broadcast %12 : vector<128x1xf32> to vector<128x256xf32>
    %14 = arith.addf %11, %13 : vector<128x256xf32>
    %15 = tpu.iota {dimensions = array<i32: 0>} : vector<128x256xi32>
    %c0_8 = arith.constant 0 : index
    %c0_9 = arith.constant 0 : index
    %16 = vector.load %arg2[%c0_8, %c0_9] : memref<1x256xi32, #tpu.memory_space<vmem>>, vector<1x256xi32>
    %17 = vector.broadcast %16 : vector<1x256xi32> to vector<128x256xi32>
    %18 = arith.cmpi eq, %15, %17 : vector<128x256xi32>
    %cst_10 = arith.constant 0.000000e+00 : f32
    %19 = vector.broadcast %cst_10 : f32 to vector<128x256xf32>
    %20 = arith.select %18, %14, %19 : vector<128x256xi1>, vector<128x256xf32>
    %cst_11 = arith.constant dense<0.000000e+00> : vector<256xf32>
    %21 = vector.multi_reduction <add>, %20, %cst_11 [0] : vector<128x256xf32> to vector<256xf32>
    %22 = vector.shape_cast %21 : vector<256xf32> to vector<1x256xf32>
    %cst_12 = arith.constant dense<0xFF800000> : vector<256xf32>
    %23 = vector.multi_reduction <maximumf>, %14, %cst_12 [0] : vector<128x256xf32> to vector<256xf32>
    %24 = vector.shape_cast %23 : vector<256xf32> to vector<1x256xf32>
    %25 = vector.broadcast %24 : vector<1x256xf32> to vector<128x256xf32>
    %26 = arith.subf %14, %25 : vector<128x256xf32>
    %27 = math.exp %26 : vector<128x256xf32>
    %cst_13 = arith.constant dense<0.000000e+00> : vector<256xf32>
    %28 = vector.multi_reduction <add>, %27, %cst_13 [0] : vector<128x256xf32> to vector<256xf32>
    %29 = vector.shape_cast %28 : vector<256xf32> to vector<1x256xf32>
    %30 = math.log %29 : vector<1x256xf32>
    %31 = arith.addf %24, %30 : vector<1x256xf32>
    %32 = arith.subf %31, %22 : vector<1x256xf32>
    %c0_14 = arith.constant 0 : index
    %c0_15 = arith.constant 0 : index
    %33 = vector.load %arg6[%c0_14, %c0_15] : memref<1x256xf32, #tpu.memory_space<vmem>>, vector<1x256xf32>
    tpu.vector_store %arg6[%c0_14, %c0_15], %32 {strides = array<i32>} : memref<1x256xf32, #tpu.memory_space<vmem>>, vector<1x256xf32>,
    return
  }
  func.func @transform_0(%arg0: i32) -> (i32, i32) {
    %c0_i32 = arith.constant 0 : i32
    %c0_i32_0 = arith.constant 0 : i32
    return %arg0, %c0_i32 : i32, i32
  }
  func.func @transform_1(%arg0: i32) -> (i32, i32) {
    %c0_i32 = arith.constant 0 : i32
    %c0_i32_0 = arith.constant 0 : i32
    return %c0_i32, %arg0 : i32, i32
  }
  func.func @transform_2(%arg0: i32) -> (i32, i32) {
    %c0_i32 = arith.constant 0 : i32
    %c0_i32_0 = arith.constant 0 : i32
    %c0_i32_1 = arith.constant 0 : i32
    return %c0_i32, %c0_i32_0 : i32, i32
  }
  func.func @transform_3(%arg0: i32) -> (i32, i32) {
    %c0_i32 = arith.constant 0 : i32
    %c0_i32_0 = arith.constant 0 : i32
    %c0_i32_1 = arith.constant 0 : i32
    return %c0_i32, %c0_i32_0 : i32, i32
  }
  func.func @transform_4(%arg0: i32) -> (i32, i32) {
    %c0_i32 = arith.constant 0 : i32
    %c0_i32_0 = arith.constant 0 : i32
    %c0_i32_1 = arith.constant 0 : i32
    return %c0_i32, %c0_i32_0 : i32, i32
  }
  func.func @transform_5(%arg0: i32) -> (i32, i32) {
    %c0_i32 = arith.constant 0 : i32
    %c0_i32_0 = arith.constant 0 : i32
    return %c0_i32, %arg0 : i32, i32
  }
}

</mosaic_0001>

<bundles_post_ra>
// kernel: tpu_custom_call.1
= control target key start
LH: loop header
LB: loop body
LE: loop exit
PB: predicated region body
PF: predicated region fallthrough
CT: control target
= control target key end

     0   :  { %10 = vsyncpa [#allocation3], 0  ;;  %s2463_s0 = inlined_call_operand.vmem [shape: s32[512,1], index: 0, kind: input, shape index: {}]   ;;  %s2464_s1 = inlined_call_operand.vmem [shape: s32[1,512], index: 1, kind: input, shape index: {}]   ;;  %s2465_s2 = inlined_call_operand.vmem [shape: bf16[128,128], index: 2, kind: input, shape index: {}]   ;;  %s2466_s3 = inlined_call_operand.vmem [shape: bf16[128,128], index: 3, kind: input, shape index: {}]   ;;  %s2467_s4 = inlined_call_operand.vmem [shape: f32[128,1], index: 4, kind: input, shape index: {}]   ;;  %s2468_s5 = inlined_call_operand.hbm [shape: f32[1,512], index: 5, kind: output, shape index: {}]  }
   0x1   :  { %12 = vsyncpa [#allocation3 + $0x1], 0  ;;  %s1866_s18 = smov 0   ;;  %s1868_s19 = smov 0  }
   0x2   :  { %s1870_s20 = smov 0   ;;  %s1872_s21 = smov 0  }
   0x3 LB: > { %s1887_s22 = sadd.s32 4294967295, %s1830_s21   ;;  %s1428_s23 = sadd.s32 4294967294, %s1830_s21   ;;  %s1830_s21 = sphi %s1872_s21, %s2474_s21   ;;  %s1826_s20 = sphi %s1870_s20, %s2473_s20   ;;  %s1822_s19 = sphi %s1868_s19, %s2472_s19   ;;  %s1818_s18 = sphi %s1866_s18, %s2471_s18  }
   0x4   : > { %s1891_s24 = sadd.s32 1, %s1830_s21   ;;  %s140_s25 = sadd.s32 1, %s1826_s20 }
   0x5   : > { %s137_s26 = ssub.s32 %s1830_s21, %s1891_s24  ;;  %p150_p0 = scmp.ne.s32.totalorder %s1826_s20, %s1822_s19 }
   0x6   : > { %p138_p1 = scmp.eq.s32.totalorder %s137_s26, 0  ;;  %p151_p2 = scmp.eq.s32.totalorder %s1887_s22, 1 }
   0x7   : > { %p156_p3 = scmp.ne.s32.totalorder %s1822_s19, %s1818_s18  ;;  %p157_p4 = scmp.eq.s32.totalorder %s1428_s23, 1 }
   0x8   : > { %s1902_s27 = scalar_select %p138_p1, %s1826_s20, %s140_s25  }
   0x9   : > { %p1904_p5 = por %p151_p2, %p150_p0  ;;  %p1908_p6 = por %p157_p4, %p156_p3 }
   0xa   : > { %p1431_p7 = scmp.ge.s32.totalorder %s1830_s21, 1  ;;  %p201_p8 = scmp.lt.s32.totalorder %s1830_s21, 3 }
   0xc   : > { %p202_p9 = pnand %p1431_p7, %p201_p8 }
   0xd   : > { %s1915_s30 = sshll.u32 (!%p202_p9), %s1887_s22, 5  ;;  %s1435_s16 = sshll.u32 (!%p202_p9), %s1887_s22, 1 }
   0xe   : > { %205 = sbr.rel (%p202_p9) target bundleno = 840 (0x348), region = 40  ;;  %p234_p10 = scmp.lt.s32.totalorder (!%p202_p9), %s1915_s30, 63 }
   0xf   : > { %p240_p11 = scmp.lt.s32.totalorder (!%p202_p9), %s1435_s16, 3  ;;  %s230_s22 = sand.u32 (!%p202_p9), 1, %s1822_s19  }
  0x10   : > { %s1432_s26 = sshll.u32 (!%p202_p9), %s230_s22, 1  ;;  %s1358_s9 = scalar_lea.hbm (!%p202_p9), %s2468_s5, %s1915_s30 }
  0x11   : > { %s1346_s11 = scalar_lea.sflag (!%p202_p9), [#allocation3], %s230_s22  ;;  %s1835_s13 = smov (!%p202_p9), [#allocation2]  }
  0x12   : > { %s1774_s14 = sshll.u32 (!%p202_p9), %s1835_s13, 4  ;;  %s1775_s14 = int_to_ptr.vmem [resolvable:$false] %s1774_s14 }
  0x13   : > { %v1832_v0 = vmov 0   ;;  %s235_s6 = scalar_select %p234_p10, %s1915_s30, 63  ;;  %v1686_v1 = vld [vmem:[%s2465_s2 + $0x38] sm:$0xff]   ;;  %v1687_v10 = vld [vmem:[%s2465_s2 + $0x30] sm:$0xff]   ;;  %v1688_v11 = vld [vmem:[%s2465_s2 + $0x28] sm:$0xff]   ;;  %v246_v57 = vlaneseq }
  0x14   : > { %1685 = vset.pattern.permute.xlu1 %v1832_v0  ;;  %1684 = vset.pattern.permute.xlu0 %v1832_v0  ;;  %v1689_v14 = vld [vmem:[%s2465_s2 + $0x20] sm:$0xff]   ;;  %v1690_v17 = vld [vmem:[%s2465_s2 + $0x18] sm:$0xff]   ;;  %v1691_v20 = vld [vmem:[%s2465_s2 + $0x10] sm:$0xff]   ;;  %v1833_v63 = vmov 1.0|1.0   ;;  %s2476_s16 = smov (!%p240_p11, %s1435_s16), 3 }
  0x15   : > { %s1434_s7 = sshll.u32 %s235_s6, 3  ;;  %1578 = vmatprep.subr.bf16.mxu0 %v1686_v1  ;;  %v1692_v23 = vld [vmem:[%s2465_s2 + $0x8] sm:$0xff]   ;;  %v1693_v26 = vld [vmem:[%s2465_s2] sm:$0xff]   ;;  %v748_v43 = vld [vmem:[%s2467_s4 + $0x18] sm:$0xff]  ;;  %v2029_v60 = vand.u32 127, %v246_v57  ;;  %s242_s25 = scalar_lea.vmem %s2464_s1, %s2476_s16 }
  0x16   : > { %s1922_s10 = scalar_lea.vmem %s2463_s0, %s1434_s7  ;;  %1579 = vmatpush3.bf16.msra.mxu0 %v1686_v1  ;;  %v746_v41 = vld [vmem:[%s2467_s4 + $0x8] sm:$0xff]  ;;  %v745_v42 = vld [vmem:[%s2467_s4] sm:$0xff]  ;;  %v747_v44 = vld [vmem:[%s2467_s4 + $0x10] sm:$0xff]  ;;  %s1776_s15 = scalar_lea.vmem %s1775_s14, 64 }
  0x17   : > { %v250_v2 = vld [vmem:[%s1922_s10 + $0x10] sm:$0xff]  ;;  %v248_v3 = vld [vmem:[%s1922_s10] sm:$0xff]  ;;  %v251_v4 = vld [vmem:[%s1922_s10 + $0x18] sm:$0xff]  ;;  %1580 = vmatprep.subr.bf16.mxu0 %v1687_v10 }
  0x18   : > { %287 = vperm.xlu1 %1685, %v250_v2   ;;  %281 = vperm.xlu0 %1684, %v248_v3   ;;  %v249_v5 = vld [vmem:[%s1922_s10 + $0x8] sm:$0xff]  ;;  %v252_v7 = vld [vmem:[%s1922_s10 + $0x20] sm:$0xff]  ;;  %v255_v8 = vld [vmem:[%s1922_s10 + $0x38] sm:$0xff] }
  0x19   : > { %v253_v6 = vld [vmem:[%s1922_s10 + $0x28] sm:$0xff]  ;;  %v254_v9 = vld [vmem:[%s1922_s10 + $0x30] sm:$0xff]  ;;  %v256_v13 = vld [vmem:[%s1922_s10 + $0x40] sm:$0xff] }
  0x1a   : > { %v257_v12 = vld [vmem:[%s1922_s10 + $0x48] sm:$0xff]  ;;  %1581 = vmatpush3.bf16.msra.mxu0 %v1687_v10  ;;  %v259_v15 = vld [vmem:[%s1922_s10 + $0x58] sm:$0xff]  ;;  %v258_v16 = vld [vmem:[%s1922_s10 + $0x50] sm:$0xff] }
  0x1b   : > { %1582 = vmatprep.subr.bf16.mxu0 %v1688_v11  ;;  %v261_v18 = vld [vmem:[%s1922_s10 + $0x68] sm:$0xff]  ;;  %v260_v19 = vld [vmem:[%s1922_s10 + $0x60] sm:$0xff]  ;;  %v263_v21 = vld [vmem:[%s1922_s10 + $0x78] sm:$0xff] }
  0x1c   : > { %290 = vperm.xlu1 %1685, %v251_v4   ;;  %284 = vperm.xlu0 %1684, %v249_v5   ;;  %v262_v22 = vld [vmem:[%s1922_s10 + $0x70] sm:$0xff]  ;;  %v265_v24 = vld [vmem:[%s1922_s10 + $0x88] sm:$0xff]  ;;  %v264_v25 = vld [vmem:[%s1922_s10 + $0x80] sm:$0xff] }
  0x1d   : > { %v267_v27 = vld [vmem:[%s1922_s10 + $0x98] sm:$0xff]  ;;  %v266_v28 = vld [vmem:[%s1922_s10 + $0x90] sm:$0xff]  ;;  %v269_v29 = vld [vmem:[%s1922_s10 + $0xa8] sm:$0xff] }
  0x1e   : > { %1583 = vmatpush3.bf16.msra.mxu0 %v1688_v11  ;;  %v268_v30 = vld [vmem:[%s1922_s10 + $0xa0] sm:$0xff]  ;;  %v271_v31 = vld [vmem:[%s1922_s10 + $0xb8] sm:$0xff]  ;;  %v270_v32 = vld [vmem:[%s1922_s10 + $0xb0] sm:$0xff] }
  0x1f   : > { %1584 = vmatprep.subr.bf16.mxu0 %v1689_v14  ;;  %v273_v33 = vld [vmem:[%s1922_s10 + $0xc8] sm:$0xff]  ;;  %v272_v34 = vld [vmem:[%s1922_s10 + $0xc0] sm:$0xff]  ;;  %v275_v35 = vld [vmem:[%s1922_s10 + $0xd8] sm:$0xff] }
  0x20   : > { %296 = vperm.xlu1 %1685, %v253_v6   ;;  %293 = vperm.xlu0 %1684, %v252_v7   ;;  %v274_v36 = vld [vmem:[%s1922_s10 + $0xd0] sm:$0xff]  ;;  %v277_v37 = vld [vmem:[%s1922_s10 + $0xe8] sm:$0xff]  ;;  %v276_v38 = vld [vmem:[%s1922_s10 + $0xe0] sm:$0xff] }
  0x21   : > { %v279_v39 = vld [vmem:[%s1922_s10 + $0xf8] sm:$0xff]  ;;  %v278_v40 = vld [vmem:[%s1922_s10 + $0xf0] sm:$0xff]  ;;  %v750_v45 = vld [vmem:[%s2467_s4 + $0x28] sm:$0xff]  ;;  %s232_s10 = scalar_lea.vmem [#allocation2], %s1432_s26 }
  0x22   : > { %1585 = vmatpush3.bf16.msra.mxu0 %v1689_v14  ;;  %v749_v46 = vld [vmem:[%s2467_s4 + $0x20] sm:$0xff]  ;;  %v752_v47 = vld [vmem:[%s2467_s4 + $0x38] sm:$0xff]  ;;  %v751_v48 = vld [vmem:[%s2467_s4 + $0x30] sm:$0xff]  ;;  %s1360_s6 = sshll.u32 %s232_s10, 4  ;;  %s1361_s6 = int_to_ptr.vmem [resolvable:$true] %s1360_s6 }
  0x23   : > { %1586 = vmatprep.subr.bf16.mxu0 %v1690_v17  ;;  %v754_v49 = vld [vmem:[%s2467_s4 + $0x48] sm:$0xff]  ;;  %v753_v50 = vld [vmem:[%s2467_s4 + $0x40] sm:$0xff]  ;;  %v756_v51 = vld [vmem:[%s2467_s4 + $0x58] sm:$0xff]  ;;  %s1770_s12 = scalar_lea.vmem %s1361_s6, 32  ;;  %p1777_p1 = scmp.lt.s32.totalorder %s1361_s6, %s1775_s14 }
  0x24   : > { %302 = vperm.xlu1 %1685, %v255_v8   ;;  %299 = vperm.xlu0 %1684, %v254_v9   ;;  %v755_v52 = vld [vmem:[%s2467_s4 + $0x50] sm:$0xff]  ;;  %v758_v53 = vld [vmem:[%s2467_s4 + $0x68] sm:$0xff]  ;;  %v757_v54 = vld [vmem:[%s2467_s4 + $0x60] sm:$0xff]  ;;  %p1771_p12 = scmp.ne.s32.totalorder %s1361_s6, %s1770_s12  ;;  %p1778_p2 = scmp.lt.s32.totalorder %s1776_s15, %s1770_s12 }
  0x25   : > { %v760_v55 = vld [vmem:[%s2467_s4 + $0x78] sm:$0xff]  ;;  %v759_v56 = vld [vmem:[%s2467_s4 + $0x70] sm:$0xff] }
  0x26   : > { %1587 = vmatpush3.bf16.msra.mxu0 %v1690_v17  ;;  %p1772_p13 = pnand %p1771_p12, %p1904_p5  ;;  %p1779_p3 = por %p1778_p2, %p1777_p1 }
  0x27   : > { %1588 = vmatprep.subr.bf16.mxu0 %v1691_v20 }
  0x28   : > { %308 = vperm.xlu1 %1685, %v257_v12   ;;  %305 = vperm.xlu0 %1684, %v256_v13   ;;  %p1773_p0 = pneg %p1772_p13 }
  0x2a   : > { %1589 = vmatpush3.bf16.msra.mxu0 %v1691_v20  ;;  %p1780_p4 = pnand %p1779_p3, %p1773_p0 }
  0x2b   : > { %1590 = vmatprep.subr.bf16.mxu0 %v1692_v23 }
  0x2c   : > { %314 = vperm.xlu1 %1685, %v259_v15   ;;  %311 = vperm.xlu0 %1684, %v258_v16  }
  0x2e   : > { %1591 = vmatpush3.bf16.msra.mxu0 %v1692_v23 }
  0x2f   : > { %1592 = vmatprep.subr.bf16.mxu0 %v1693_v26 }
  0x30   : > { %320 = vperm.xlu1 %1685, %v261_v18   ;;  %317 = vperm.xlu0 %1684, %v260_v19  }
  0x32   : > { %1593 = vmatpush3.bf16.msra.mxu0 %v1693_v26 }
  0x34   : > { %326 = vperm.xlu1 %1685, %v263_v21   ;;  %323 = vperm.xlu0 %1684, %v262_v22  }
  0x38   : > { %332 = vperm.xlu1 %1685, %v265_v24   ;;  %329 = vperm.xlu0 %1684, %v264_v25  }
  0x3c   : > { %338 = vperm.xlu1 %1685, %v267_v27   ;;  %335 = vperm.xlu0 %1684, %v266_v28   ;;  %v2082_v28 = vld [vmem:[%s2466_s3] sm:$0xff]  }
  0x40   : > { %344 = vperm.xlu1 %1685, %v269_v29   ;;  %341 = vperm.xlu0 %1684, %v268_v30   ;;  %v2087_v29 = vld [vmem:[%s2466_s3 + $0x10] sm:$0xff]  }
  0x41   : > { %1566 = vmatprep.mubr.bf16.mxu1 %v2087_v29 }
  0x44   : > { %350 = vperm.xlu1 %1685, %v271_v31   ;;  %347 = vperm.xlu0 %1684, %v270_v32  }
  0x48   : > { %356 = vperm.xlu1 %1685, %v273_v33   ;;  %353 = vperm.xlu0 %1684, %v272_v34  }
  0x4c   : > { %362 = vperm.xlu1 %1685, %v275_v35   ;;  %359 = vperm.xlu0 %1684, %v274_v36  }
  0x50   : > { %368 = vperm.xlu1 %1685, %v277_v37   ;;  %365 = vperm.xlu0 %1684, %v276_v38  }
  0x54   : > { %374 = vperm.xlu1 %1685, %v279_v39   ;;  %371 = vperm.xlu0 %1684, %v278_v40  }
  0x58   : > { %768 = vperm.xlu1 %1685, %v746_v41   ;;  %763 = vperm.xlu0 %1684, %v745_v42  }
  0x5c   : > { %778 = vperm.xlu1 %1685, %v748_v43   ;;  %773 = vperm.xlu0 %1684, %v747_v44  }
  0x60   : > { %788 = vperm.xlu1 %1685, %v750_v45   ;;  %783 = vperm.xlu0 %1684, %v749_v46  }
  0x64   : > { %798 = vperm.xlu1 %1685, %v752_v47   ;;  %793 = vperm.xlu0 %1684, %v751_v48  }
  0x68   : > { %808 = vperm.xlu1 %1685, %v754_v49   ;;  %803 = vperm.xlu0 %1684, %v753_v50  }
  0x6c   : > { %818 = vperm.xlu1 %1685, %v756_v51   ;;  %813 = vperm.xlu0 %1684, %v755_v52  }
  0x70   : > { %828 = vperm.xlu1 %1685, %v758_v53   ;;  %823 = vperm.xlu0 %1684, %v757_v54  }
  0x74   : > { %838 = vperm.xlu1 %1685, %v760_v55   ;;  %833 = vperm.xlu0 %1684, %v759_v56  }
  0x93   : > { %v288_v58 = vpop.permute.xlu1 %287  ;;  %v282_v59 = vpop.permute.xlu0 %281 }
  0x94   : > { %vm378_vm0 = vcmp.eq.s32.totalorder %v288_v58, %v2029_v60  ;;  %vm376_vm3 = vcmp.eq.s32.totalorder %v282_v59, %v2029_v60 }
  0x97   : > { %v291_v61 = vpop.permute.xlu1 %290  ;;  %v285_v62 = vpop.permute.xlu0 %284 }
  0x98   : > { %vm379_vm1 = vcmp.eq.s32.totalorder %v291_v61, %v2029_v60  ;;  %vm377_vm2 = vcmp.eq.s32.totalorder %v285_v62, %v2029_v60 }
  0x99   : > { %vm1478_vm4 = vmpackc.low %vm379_vm1, %vm378_vm0 }
  0x9a   : > { %vm1476_vm5 = vmpackc.low %vm377_vm2, %vm376_vm3 }
  0x9b   : > { %1594 = vmatprep.mubr.msk.bf16.mxu0 %vm1476_vm5, %v1833_v63  ;;  %v297_v0 = vpop.permute.xlu1 %296  ;;  %v294_v1 = vpop.permute.xlu0 %293 }
  0x9c   : > { %vm381_vm6 = vcmp.eq.s32.totalorder %v297_v0, %v2029_v60  ;;  %1595 = vmatmul.mubr.msk.bf16.vlgmr.msra.gmra.mxu0 %vm1478_vm4, %v1833_v63  ;;  %vm380_vm7 = vcmp.eq.s32.totalorder %v294_v1, %v2029_v60 }
  0x9d   : > { %vm1480_vm8 = vmpackc.low %vm381_vm6, %vm380_vm7 }
  0x9e   : > { %1598 = vmatprep.mubr.msk.bf16.mxu0 %vm1480_vm8, %v1833_v63 }
  0x9f   : > { %v303_v2 = vpop.permute.xlu1 %302  ;;  %v300_v3 = vpop.permute.xlu0 %299 }
  0xa0   : > { %vm383_vm9 = vcmp.eq.s32.totalorder %v303_v2, %v2029_v60  ;;  %vm382_vm10 = vcmp.eq.s32.totalorder %v300_v3, %v2029_v60 }
  0xa1   : > { %vm1482_vm11 = vmpackc.low %vm383_vm9, %vm382_vm10 }
  0xa3   : > { %v309_v4 = vpop.permute.xlu1 %308  ;;  %v306_v5 = vpop.permute.xlu0 %305 }
  0xa4   : > { %vm385_vm12 = vcmp.eq.s32.totalorder %v309_v4, %v2029_v60  ;;  %1599 = vmatmul.mubr.msk.bf16.gmra.mxu0 %vm1482_vm11, %v1833_v63  ;;  %vm384_vm13 = vcmp.eq.s32.totalorder %v306_v5, %v2029_v60 }
  0xa5   : > { %vm1484_vm14 = vmpackc.low %vm385_vm12, %vm384_vm13 }
  0xa6   : > { %1602 = vmatprep.mubr.msk.bf16.mxu0 %vm1484_vm14, %v1833_v63 }
  0xa7   : > { %v315_v6 = vpop.permute.xlu1 %314  ;;  %v312_v7 = vpop.permute.xlu0 %311 }
  0xa8   : > { %vm387_vm15 = vcmp.eq.s32.totalorder %v315_v6, %v2029_v60  ;;  %vm386_vm0 = vcmp.eq.s32.totalorder %v312_v7, %v2029_v60 }
  0xa9   : > { %vm1486_vm1 = vmpackc.low %vm387_vm15, %vm386_vm0 }
  0xab   : > { %v321_v8 = vpop.permute.xlu1 %320  ;;  %v318_v9 = vpop.permute.xlu0 %317 }
  0xac   : > { %vm389_vm2 = vcmp.eq.s32.totalorder %v321_v8, %v2029_v60  ;;  %1603 = vmatmul.mubr.msk.bf16.gmra.mxu0 %vm1486_vm1, %v1833_v63  ;;  %vm388_vm3 = vcmp.eq.s32.totalorder %v318_v9, %v2029_v60 }
  0xad   : > { %vm1488_vm4 = vmpackc.low %vm389_vm2, %vm388_vm3 }
  0xae   : > { %1606 = vmatprep.mubr.msk.bf16.mxu0 %vm1488_vm4, %v1833_v63 }
  0xaf   : > { %v327_v10 = vpop.permute.xlu1 %326  ;;  %v324_v11 = vpop.permute.xlu0 %323 }
  0xb0   : > { %vm391_vm5 = vcmp.eq.s32.totalorder %v327_v10, %v2029_v60  ;;  %vm390_vm6 = vcmp.eq.s32.totalorder %v324_v11, %v2029_v60 }
  0xb1   : > { %vm1490_vm7 = vmpackc.low %vm391_vm5, %vm390_vm6 }
  0xb3   : > { %v333_v12 = vpop.permute.xlu1 %332  ;;  %v330_v13 = vpop.permute.xlu0 %329 }
  0xb4   : > { %vm393_vm8 = vcmp.eq.s32.totalorder %v333_v12, %v2029_v60  ;;  %1607 = vmatmul.mubr.msk.bf16.gmra.mxu0 %vm1490_vm7, %v1833_v63  ;;  %vm392_vm9 = vcmp.eq.s32.totalorder %v330_v13, %v2029_v60 }
  0xb5   : > { %vm1492_vm10 = vmpackc.low %vm393_vm8, %vm392_vm9 }
  0xb6   : > { %1610 = vmatprep.mubr.msk.bf16.mxu0 %vm1492_vm10, %v1833_v63 }
  0xb7   : > { %v339_v14 = vpop.permute.xlu1 %338  ;;  %v336_v15 = vpop.permute.xlu0 %335 }
  0xb8   : > { %vm395_vm11 = vcmp.eq.s32.totalorder %v339_v14, %v2029_v60  ;;  %vm394_vm12 = vcmp.eq.s32.totalorder %v336_v15, %v2029_v60  ;;  %v1696_v15 = vld [vmem:[%s2466_s3 + $0x8] sm:$0xff]  }
  0xb9   : > { %vm1494_vm13 = vmpackc.low %vm395_vm11, %vm394_vm12 }
  0xbb   : > { %v345_v16 = vpop.permute.xlu1 %344  ;;  %v342_v17 = vpop.permute.xlu0 %341 }
  0xbc   : > { %vm397_vm14 = vcmp.eq.s32.totalorder %v345_v16, %v2029_v60  ;;  %1611 = vmatmul.mubr.msk.bf16.gmra.mxu0 %vm1494_vm13, %v1833_v63  ;;  %vm396_vm15 = vcmp.eq.s32.totalorder %v342_v17, %v2029_v60  ;;  %v1697_v16 = vld [vmem:[%s2466_s3 + $0x18] sm:$0xff]   ;;  %v1698_v17 = vld [vmem:[%s2466_s3 + $0x20] sm:$0xff]  }
  0xbd   : > { %vm1496_vm0 = vmpackc.low %vm397_vm14, %vm396_vm15 }
  0xbe   : > { %1614 = vmatprep.mubr.msk.bf16.mxu0 %vm1496_vm0, %v1833_v63 }
  0xbf   : > { %v351_v18 = vpop.permute.xlu1 %350  ;;  %v348_v19 = vpop.permute.xlu0 %347 }
  0xc0   : > { %vm399_vm1 = vcmp.eq.s32.totalorder %v351_v18, %v2029_v60  ;;  %vm398_vm2 = vcmp.eq.s32.totalorder %v348_v19, %v2029_v60  ;;  %v1699_v18 = vld [vmem:[%s2466_s3 + $0x28] sm:$0xff]   ;;  %v1700_v19 = vld [vmem:[%s2466_s3 + $0x30] sm:$0xff]  }
  0xc1   : > { %vm1498_vm3 = vmpackc.low %vm399_vm1, %vm398_vm2 }
  0xc3   : > { %v357_v20 = vpop.permute.xlu1 %356  ;;  %v354_v21 = vpop.permute.xlu0 %353 }
  0xc4   : > { %vm401_vm4 = vcmp.eq.s32.totalorder %v357_v20, %v2029_v60  ;;  %1615 = vmatmul.mubr.msk.bf16.gmra.mxu0 %vm1498_vm3, %v1833_v63  ;;  %vm400_vm5 = vcmp.eq.s32.totalorder %v354_v21, %v2029_v60  ;;  %v1701_v20 = vld [vmem:[%s2466_s3 + $0x38] sm:$0xff]   ;;  %v2121_v21 = vshrl.u32 %v246_v57, 7 }
  0xc5   : > { %vm1500_vm6 = vmpackc.low %vm401_vm4, %vm400_vm5 }
  0xc6   : > { %1618 = vmatprep.mubr.msk.bf16.mxu0 %vm1500_vm6, %v1833_v63 }
  0xc7   : > { %v363_v22 = vpop.permute.xlu1 %362  ;;  %v360_v23 = vpop.permute.xlu0 %359 }
  0xc8   : > { %vm403_vm7 = vcmp.eq.s32.totalorder %v363_v22, %v2029_v60  ;;  %vm402_vm8 = vcmp.eq.s32.totalorder %v360_v23, %v2029_v60  ;;  %v1022_v23 = vsub.s32 0, %v2121_v21 }
  0xc9   : > { %vm1502_vm9 = vmpackc.low %vm403_vm7, %vm402_vm8 }
  0xcb   : > { %v369_v24 = vpop.permute.xlu1 %368  ;;  %v366_v25 = vpop.permute.xlu0 %365 }
  0xcc   : > { %vm405_vm10 = vcmp.eq.s32.totalorder %v369_v24, %v2029_v60  ;;  %1619 = vmatmul.mubr.msk.bf16.gmra.mxu0 %vm1502_vm9, %v1833_v63  ;;  %vm404_vm11 = vcmp.eq.s32.totalorder %v366_v25, %v2029_v60  ;;  %v1019_v25 = vld [vmem:[%s242_s25] sm:$0x3] }
  0xcd   : > { %vm1504_vm12 = vmpackc.low %vm405_vm10, %vm404_vm11 }
  0xce   : > { %1622 = vmatprep.mubr.msk.bf16.mxu0 %vm1504_vm12, %v1833_v63 }
  0xcf   : > { %v375_v26 = vpop.permute.xlu1 %374  ;;  %v372_v27 = vpop.permute.xlu0 %371 }
  0xd0   : > { %vm407_vm13 = vcmp.eq.s32.totalorder %v375_v26, %v2029_v60  ;;  %vm406_vm14 = vcmp.eq.s32.totalorder %v372_v27, %v2029_v60  ;;  %v1026_v26 = vsub.s32 1, %v2121_v21 }
  0xd1   : > { %vm1506_vm15 = vmpackc.low %vm407_vm13, %vm406_vm14 }
  0xd3   : > { %v764_v22 = vpop.permute.xlu0 %763  ;;  %v769_v24 = vpop.permute.xlu1 %768 }
  0xd4   : > { %1623 = vmatmul.mubr.msk.bf16.gmra.mxu0 %vm1506_vm15, %v1833_v63 }
  0xd5   : > { %1562 = vmatprep.mubr.bf16.mxu0 %v2082_v28 }
  0xd7   : > { %v774_v27 = vpop.permute.xlu0 %773 }
 0x15c   : > { %v1596_v30 = vpop.f32.mrf.mxu0 }
 0x15e   : > { %v586_v31 = vpop.f32.mrf.mxu0 }
 0x160   : > { %v1597_v32 = vpop.f32.mrf.mxu0 }
 0x161   : > { %v2091_v33 = vpack.c.bf16 %v1597_v32, %v1596_v30 }
 0x162   : > { %v589_v34 = vpop.f32.mrf.mxu0 }
 0x163   : > { %v2093_v35 = vpack.c.bf16 %v589_v34, %v586_v31  ;;  %v1004_v31 = vadd.s32 8, %v2121_v21 }
 0x164   : > { %v1600_v36 = vpop.f32.mrf.mxu0 }
 0x166   : > { %v602_v37 = vpop.f32.mrf.mxu0 }
 0x168   : > { %v1601_v38 = vpop.f32.mrf.mxu0 }
 0x169   : > { %v716_v39 = vpack.c.bf16 %v1601_v38, %v1600_v36 }
 0x16a   : > { %v605_v40 = vpop.f32.mrf.mxu0 }
 0x16b   : > { %v715_v41 = vpack.c.bf16 %v605_v40, %v602_v37  ;;  %v784_v40 = vpop.permute.xlu0 %783 }
 0x16c   : > { %v1604_v42 = vpop.f32.mrf.mxu0 }
 0x16e   : > { %v618_v43 = vpop.f32.mrf.mxu0 }
 0x170   : > { %v1605_v44 = vpop.f32.mrf.mxu0 }
 0x171   : > { %v718_v10 = vpack.c.bf16 %v1605_v44, %v1604_v42 }
 0x172   : > { %v621_v45 = vpop.f32.mrf.mxu0 }
 0x173   : > { %v717_v12 = vpack.c.bf16 %v621_v45, %v618_v43 }
 0x174   : > { %v1608_v46 = vpop.f32.mrf.mxu0 }
 0x176   : > { %v634_v47 = vpop.f32.mrf.mxu0 }
 0x178   : > { %v1609_v48 = vpop.f32.mrf.mxu0 }
 0x179   : > { %v720_v5 = vpack.c.bf16 %v1609_v48, %v1608_v46  ;;  %v1007_v48 = vadd.s32 32, %v2121_v21 }
 0x17a   : > { %v637_v49 = vpop.f32.mrf.mxu0 }
 0x17b   : > { %v719_v8 = vpack.c.bf16 %v637_v49, %v634_v47 }
 0x17c   : > { %v1612_v50 = vpop.f32.mrf.mxu0 }
 0x17e   : > { %v650_v51 = vpop.f32.mrf.mxu0 }
 0x180   : > { %v1613_v52 = vpop.f32.mrf.mxu0 }
 0x181   : > { %v722_v53 = vpack.c.bf16 %v1613_v52, %v1612_v50  ;;  %v1006_v52 = vadd.s32 24, %v2121_v21 }
 0x182   : > { %v653_v54 = vpop.f32.mrf.mxu0 }
 0x183   : > { %v721_v55 = vpack.c.bf16 %v653_v54, %v650_v51 }
 0x184   : > { %v1616_v56 = vpop.f32.mrf.mxu0 }
 0x186   : > { %v666_v58 = vpop.f32.mrf.mxu0 }
 0x188   : > { %v1617_v59 = vpop.f32.mrf.mxu0 }
 0x189   : > { %v724_v13 = vpack.c.bf16 %v1617_v59, %v1616_v56 }
 0x18a   : > { %v669_v60 = vpop.f32.mrf.mxu0 }
 0x18b   : > { %v723_v14 = vpack.c.bf16 %v669_v60, %v666_v58  ;;  %v1008_v58 = vadd.s32 40, %v2121_v21  ;;  %v2159_v60 = vadd.s32 48, %v2121_v21 }
 0x18c   : > { %v1620_v61 = vpop.f32.mrf.mxu0 }
 0x18e   : > { %v682_v62 = vpop.f32.mrf.mxu0 }
 0x190   : > { %v1621_v63 = vpop.f32.mrf.mxu0 }
 0x191   : > { %v726_v9 = vpack.c.bf16 %v1621_v63, %v1620_v61  ;;  %v794_v63 = vpop.permute.xlu0 %793 }
 0x192   : > { %v685_v0 = vpop.f32.mrf.mxu0 }
 0x193   : > { %v725_v11 = vpack.c.bf16 %v685_v0, %v682_v62 }
 0x194   : > { %v1624_v1 = vpop.f32.mrf.mxu0 }
 0x196   : > { %v698_v2 = vpop.f32.mrf.mxu0 }
 0x198   : > { %v1625_v3 = vpop.f32.mrf.mxu0 }
 0x199   : > { %v728_v4 = vpack.c.bf16 %v1625_v3, %v1624_v1 }
 0x19a   : > { %v701_v6 = vpop.f32.mrf.mxu0 }
 0x19b   : > { %v727_v7 = vpack.c.bf16 %v701_v6, %v698_v2  ;;  %1546 = vmatprep.subr.bf16.mxu0 %v728_v4  ;;  %1626 = vmatprep.subr.bf16.mxu1 %v728_v4 }
 0x19c   : > { %1547 = vmatpush3.bf16.xpose.msra.mxu0 %v720_v5  ;;  %1634 = vmatpush3.bf16.xpose.msra.mxu1 %v720_v5 }
 0x19d   : > { %1548 = vmatprep.subr.bf16.mxu0 %v727_v7  ;;  %1627 = vmatprep.subr.bf16.mxu1 %v727_v7 }
 0x1a4   : > { %1549 = vmatpush3.bf16.xpose.msra.mxu0 %v719_v8  ;;  %1635 = vmatpush3.bf16.xpose.msra.mxu1 %v719_v8  ;;  %v1010_v8 = vadd.s32 56, %v2121_v21 }
 0x1a5   : > { %1550 = vmatprep.subr.bf16.mxu0 %v726_v9  ;;  %1628 = vmatprep.subr.bf16.mxu1 %v726_v9 }
 0x1ac   : > { %1551 = vmatpush3.bf16.xpose.msra.mxu0 %v718_v10  ;;  %1636 = vmatpush3.bf16.xpose.msra.mxu1 %v718_v10 }
 0x1ad   : > { %1552 = vmatprep.subr.bf16.mxu0 %v725_v11  ;;  %1629 = vmatprep.subr.bf16.mxu1 %v725_v11 }
 0x1b4   : > { %1553 = vmatpush3.bf16.xpose.msra.mxu0 %v717_v12  ;;  %1637 = vmatpush3.bf16.xpose.msra.mxu1 %v717_v12 }
 0x1b5   : > { %1554 = vmatprep.subr.bf16.mxu0 %v724_v13  ;;  %1630 = vmatprep.subr.bf16.mxu1 %v724_v13 }
 0x1bc   : > { %1555 = vmatpush3.bf16.xpose.msra.mxu0 %v716_v39  ;;  %1638 = vmatpush3.bf16.xpose.msra.mxu1 %v716_v39  ;;  %v1005_v39 = vadd.s32 16, %v2121_v21 }
 0x1bd   : > { %1556 = vmatprep.subr.bf16.mxu0 %v723_v14  ;;  %1631 = vmatprep.subr.bf16.mxu1 %v723_v14  ;;  %v1011_v14 = vadd.s32 64, %v2121_v21 }
 0x1c4   : > { %1557 = vmatpush3.bf16.xpose.msra.mxu0 %v715_v41  ;;  %1639 = vmatpush3.bf16.xpose.msra.mxu1 %v715_v41 }
 0x1c5   : > { %1558 = vmatprep.subr.bf16.mxu0 %v722_v53  ;;  %1632 = vmatprep.subr.bf16.mxu1 %v722_v53 }
 0x1cc   : > { %1559 = vmatpush3.bf16.xpose.msra.mxu0 %v2091_v33  ;;  %1640 = vmatpush3.bf16.xpose.msra.mxu1 %v2091_v33  ;;  %v2131_v33 = vrot.slane %v1019_v25, %v1026_v26 }
 0x1cd   : > { %1560 = vmatprep.subr.bf16.mxu0 %v721_v55  ;;  %1633 = vmatprep.subr.bf16.mxu1 %v721_v55 }
 0x1ce   : > { %vm1029_vm2 = vcmp.eq.s32.totalorder %v2121_v21, %v2131_v33  ;;  %vm1031_vm3 = vcmp.eq.s32.totalorder %v1004_v31, %v2131_v33  ;;  %vm1033_vm5 = vcmp.eq.s32.totalorder %v1005_v39, %v2131_v33  ;;  %vm1037_vm7 = vcmp.eq.s32.totalorder %v1007_v48, %v2131_v33 }
 0x1cf   : > { %vm1039_vm10 = vcmp.eq.s32.totalorder %v1008_v58, %v2131_v33  ;;  %vm1035_vm12 = vcmp.eq.s32.totalorder %v1006_v52, %v2131_v33  ;;  %vm1041_vm13 = vcmp.eq.s32.totalorder %v2159_v60, %v2131_v33  ;;  %vm1043_vm15 = vcmp.eq.s32.totalorder %v1010_v8, %v2131_v33 }
 0x1d4   : > { %1561 = vmatpush3.bf16.xpose.msra.mxu0 %v2093_v35  ;;  %1641 = vmatpush3.bf16.xpose.msra.mxu1 %v2093_v35  ;;  %v779_v35 = vpop.permute.xlu1 %778 }
 0x1d8   : > { %v789_v53 = vpop.permute.xlu1 %788 }
 0x1db   : > { %1563 = vmatmul.mubr.bf16.vlgmr.msra.gmra.mxu0 %v2082_v28  ;;  %1567 = vmatmul.mubr.bf16.vlgmr.msra.gmra.mxu1 %v2087_v29  ;;  %v2128_v29 = vrot.slane %v1019_v25, %v1022_v23  ;;  %v1012_v23 = vadd.s32 72, %v2121_v21 }
 0x1dc   : > { %1564 = vmatprep.mubr.bf16.mxu0 %v1696_v15  ;;  %1568 = vmatprep.mubr.bf16.mxu1 %v1697_v16 }
 0x1dd   : > { %vm1028_vm0 = vcmp.eq.s32.totalorder %v2121_v21, %v2128_v29  ;;  %vm1030_vm1 = vcmp.eq.s32.totalorder %v1004_v31, %v2128_v29  ;;  %vm1032_vm4 = vcmp.eq.s32.totalorder %v1005_v39, %v2128_v29  ;;  %vm1036_vm6 = vcmp.eq.s32.totalorder %v1007_v48, %v2128_v29 }
 0x1de   : > { %vm1034_vm8 = vcmp.eq.s32.totalorder %v1006_v52, %v2128_v29  ;;  %vm1038_vm9 = vcmp.eq.s32.totalorder %v1008_v58, %v2128_v29  ;;  %vm1040_vm11 = vcmp.eq.s32.totalorder %v2159_v60, %v2128_v29  ;;  %vm1042_vm14 = vcmp.eq.s32.totalorder %v1010_v8, %v2128_v29 }
 0x1e3   : > { %1565 = vmatmul.mubr.bf16.gmra.mxu0 %v1696_v15  ;;  %1569 = vmatmul.mubr.bf16.gmra.mxu1 %v1697_v16  ;;  %v799_v15 = vpop.permute.xlu1 %798 }
 0x1e4   : > { %1570 = vmatprep.mubr.bf16.mxu1 %v1698_v17 }
 0x1eb   : > { %1571 = vmatmul.mubr.bf16.gmra.mxu1 %v1698_v17 }
 0x1ec   : > { %1572 = vmatprep.mubr.bf16.mxu1 %v1699_v18 }
 0x1f3   : > { %1573 = vmatmul.mubr.bf16.gmra.mxu1 %v1699_v18 }
 0x1f4   : > { %1574 = vmatprep.mubr.bf16.mxu1 %v1700_v19 }
 0x1fb   : > { %1575 = vmatmul.mubr.bf16.gmra.mxu1 %v1700_v19 }
 0x1fc   : > { %1576 = vmatprep.mubr.bf16.mxu1 %v1701_v20 }
 0x203   : > { %1577 = vmatmul.mubr.bf16.gmra.mxu1 %v1701_v20 }
 0x29b   : > { %v923_v28 = vpop.f32.mrf.mxu0  ;;  %v943_v30 = vpop.f32.mrf.mxu1 }
 0x29c   : > { %v2133_v36 = vadd.f32 %v923_v28, %v764_v22  ;;  %v2168_v5 = vadd.f32 %v943_v30, %v784_v40 }
 0x29d   : > { %v925_v32 = vpop.f32.mrf.mxu0  ;;  %v945_v34 = vpop.f32.mrf.mxu1 }
 0x29e   : > { %v2139_v41 = vadd.f32 %v925_v32, %v764_v22  ;;  %v1060_v45 = vsel %vm1028_vm0, %v2133_v36, 0.0  ;;  %v2183_v16 = vadd.f32 %v945_v34, %v784_v40  ;;  %v1068_v20 = vsel %vm1036_vm6, %v2168_v5, 0.0 }
 0x29f   : > { %v927_v37 = vpop.f32.mrf.mxu0  ;;  %v947_v38 = vpop.f32.mrf.mxu1  ;;  %vm1044_vm0 = vcmp.eq.s32.totalorder %v1011_v14, %v2128_v29 }
 0x2a0   : > { %v2141_v42 = vadd.f32 %v927_v37, %v769_v24  ;;  %v1061_v54 = vsel %vm1029_vm2, %v2139_v41, 0.0  ;;  %v2178_v12 = vadd.f32 %v947_v38, %v789_v53  ;;  %v1069_v34 = vsel %vm1037_vm7, %v2183_v16, 0.0 }
 0x2a1   : > { %v929_v43 = vpop.f32.mrf.mxu0  ;;  %v949_v44 = vpop.f32.mrf.mxu1  ;;  %vm1046_vm2 = vcmp.eq.s32.totalorder %v1012_v23, %v2128_v29 }
 0x2a2   : > { %v1062_v46 = vsel %vm1030_vm1, %v2141_v42, 0.0  ;;  %v2148_v47 = vadd.f32 %v929_v43, %v769_v24  ;;  %v804_v24 = vpop.permute.xlu0 %803  ;;  %v2196_v25 = vadd.f32 %v949_v44, %v789_v53  ;;  %v1070_v30 = vsel %vm1038_vm9, %v2178_v12, 0.0  ;;  %v809_v44 = vpop.permute.xlu1 %808 }
 0x2a3   : > { %v1092_v49 = vadd.f32 %v1062_v46, %v1060_v45  ;;  %v933_v50 = vpop.f32.mrf.mxu0  ;;  %v953_v51 = vpop.f32.mrf.mxu1  ;;  %vm1045_vm1 = vcmp.eq.s32.totalorder %v1011_v14, %v2131_v33 }
 0x2a4   : > { %v1063_v55 = vsel %vm1031_vm3, %v2148_v47, 0.0  ;;  %v2155_v56 = vadd.f32 %v933_v50, %v774_v27  ;;  %v2192_v22 = vadd.f32 %v953_v51, %v794_v63  ;;  %v1071_v45 = vsel %vm1039_vm10, %v2196_v25, 0.0 }
 0x2a5   : > { %v1113_v59 = vadd.f32 %v1063_v55, %v1061_v54  ;;  %v935_v61 = vpop.f32.mrf.mxu0  ;;  %v955_v62 = vpop.f32.mrf.mxu1  ;;  %v1013_v50 = vadd.s32 80, %v2121_v21  ;;  %v1014_v54 = vadd.s32 88, %v2121_v21  ;;  %vm1047_vm3 = vcmp.eq.s32.totalorder %v1012_v23, %v2131_v33 }
 0x2a6   : > { %v1064_v0 = vsel %vm1032_vm4, %v2155_v56, 0.0  ;;  %v2163_v1 = vadd.f32 %v935_v61, %v774_v27  ;;  %v1072_v39 = vsel %vm1040_vm11, %v2192_v22, 0.0  ;;  %v814_v55 = vpop.permute.xlu0 %813 }
 0x2a7   : > { %v1093_v2 = vadd.f32 %v1092_v49, %v1064_v0  ;;  %v937_v3 = vpop.f32.mrf.mxu0  ;;  %v957_v4 = vpop.f32.mrf.mxu1  ;;  %vm1048_vm4 = vcmp.eq.s32.totalorder %v1013_v50, %v2128_v29  ;;  %vm1050_vm6 = vcmp.eq.s32.totalorder %v1014_v54, %v2128_v29  ;;  %vm1051_vm7 = vcmp.eq.s32.totalorder %v1014_v54, %v2131_v33 }
 0x2a8   : > { %v1065_v6 = vsel %vm1033_vm5, %v2163_v1, 0.0  ;;  %v2171_v7 = vadd.f32 %v937_v3, %v779_v35  ;;  %v2203_v31 = vadd.f32 %v957_v4, %v799_v15  ;;  %v1015_v3 = vadd.s32 96, %v2121_v21 }
 0x2a9   : > { %v1114_v9 = vadd.f32 %v1113_v59, %v1065_v6  ;;  %v939_v10 = vpop.f32.mrf.mxu0  ;;  %v959_v11 = vpop.f32.mrf.mxu1  ;;  %vm1049_vm5 = vcmp.eq.s32.totalorder %v1013_v50, %v2131_v33 }
 0x2aa   : > { %v1066_v13 = vsel %vm1034_vm8, %v2171_v7, 0.0  ;;  %v2187_v18 = vadd.f32 %v939_v10, %v779_v35  ;;  %v2209_v35 = vadd.f32 %v955_v62, %v794_v63  ;;  %v2222_v48 = vadd.f32 %v959_v11, %v799_v15 }
 0x2ab   : > { %v1094_v17 = vadd.f32 %v1093_v2, %v1066_v13  ;;  %v963_v19 = vpop.f32.mrf.mxu1  ;;  %v1074_v51 = vsel %vm1042_vm14, %v2203_v31, 0.0  ;;  %v819_v13 = vpop.permute.xlu1 %818  ;;  %vm1052_vm8 = vcmp.eq.s32.totalorder %v1015_v3, %v2128_v29  ;;  %vm1053_vm9 = vcmp.eq.s32.totalorder %v1015_v3, %v2131_v33 }
 0x2ac   : > { %v1067_v27 = vsel %vm1035_vm12, %v2187_v18, 0.0  ;;  %v2216_v43 = vadd.f32 %v963_v19, %v804_v24  ;;  %v1073_v58 = vsel %vm1041_vm13, %v2209_v35, 0.0  ;;  %v1075_v60 = vsel %vm1043_vm15, %v2222_v48, 0.0 }
 0x2ad   : > { %v1095_v26 = vadd.f32 %v1094_v17, %v1068_v20  ;;  %v965_v28 = vpop.f32.mrf.mxu1  ;;  %v1115_v32 = vadd.f32 %v1114_v9, %v1067_v27  ;;  %v1134_v27 = vmax.f32 %v2133_v36, %v2155_v56  ;;  %v1156_v23 = vmax.f32 %v2148_v47, %v2187_v18 }
 0x2ae   : > { %v2235_v61 = vadd.f32 %v965_v28, %v804_v24  ;;  %v1076_v0 = vsel %vm1044_vm0, %v2216_v43, 0.0  ;;  %vm1342_vm0 = vcmp.lt.s32.totalorder %v246_v57, 256 }
 0x2af   : > { %v1096_v37 = vadd.f32 %v1095_v26, %v1070_v30  ;;  %v967_v38 = vpop.f32.mrf.mxu1  ;;  %v1116_v40 = vadd.f32 %v1115_v32, %v1069_v34  ;;  %v1016_v32 = vadd.s32 104, %v2121_v21  ;;  %v1135_v34 = vmax.f32 %v2141_v42, %v2171_v7  ;;  %v829_v54 = vpop.permute.xlu1 %828 }
 0x2b0   : > { %v2228_v53 = vadd.f32 %v967_v38, %v809_v44  ;;  %v1077_v8 = vsel %vm1045_vm1, %v2235_v61, 0.0 }
 0x2b1   : > { %v1097_v46 = vadd.f32 %v1096_v37, %v1072_v39  ;;  %v969_v49 = vpop.f32.mrf.mxu1  ;;  %v1117_v52 = vadd.f32 %v1116_v40, %v1071_v45  ;;  %v824_v40 = vpop.permute.xlu0 %823  ;;  %vm1054_vm10 = vcmp.eq.s32.totalorder %v1016_v32, %v2128_v29  ;;  %vm1055_vm11 = vcmp.eq.s32.totalorder %v1016_v32, %v2131_v33 }
 0x2b2   : > { %v2247_v6 = vadd.f32 %v969_v49, %v809_v44  ;;  %v1078_v11 = vsel %vm1046_vm2, %v2228_v53, 0.0  ;;  %v1155_v44 = vmax.f32 %v2139_v41, %v2163_v1 }
 0x2b3   : > { %v1098_v59 = vadd.f32 %v1097_v46, %v1074_v51  ;;  %v973_v62 = vpop.f32.mrf.mxu1  ;;  %v1118_v63 = vadd.f32 %v1117_v52, %v1073_v58  ;;  %v1136_v58 = vmax.f32 %v1134_v27, %v2168_v5 }
 0x2b4   : > { %v2241_v2 = vadd.f32 %v973_v62, %v814_v55  ;;  %v1079_v14 = vsel %vm1047_vm3, %v2247_v6, 0.0  ;;  %v1017_v62 = vadd.s32 112, %v2121_v21 }
 0x2b5   : > { %v1099_v4 = vadd.f32 %v1098_v59, %v1076_v0  ;;  %v975_v9 = vpop.f32.mrf.mxu1  ;;  %v1119_v10 = vadd.f32 %v1118_v63, %v1075_v60  ;;  %v1137_v63 = vmax.f32 %v1135_v34, %v2178_v12  ;;  %v1138_v3 = vmax.f32 %v1136_v58, %v2192_v22 }
 0x2b6   : > { %v2258_v17 = vadd.f32 %v975_v9, %v814_v55  ;;  %v1080_v24 = vsel %vm1048_vm4, %v2241_v2, 0.0  ;;  %v1158_v9 = vmax.f32 %v1156_v23, %v2196_v25  ;;  %vm1056_vm12 = vcmp.eq.s32.totalorder %v1017_v62, %v2128_v29 }
 0x2b7   : > { %v1100_v15 = vadd.f32 %v1099_v4, %v1078_v11  ;;  %v977_v19 = vpop.f32.mrf.mxu1  ;;  %v1120_v20 = vadd.f32 %v1119_v10, %v1077_v8  ;;  %v1157_v4 = vmax.f32 %v1155_v44, %v2183_v16  ;;  %v1140_v32 = vmax.f32 %v1138_v3, %v2216_v43 }
 0x2b8   : > { %v2262_v26 = vadd.f32 %v977_v19, %v819_v13  ;;  %v1081_v45 = vsel %vm1049_vm5, %v2258_v17, 0.0  ;;  %vm1057_vm13 = vcmp.eq.s32.totalorder %v1017_v62, %v2131_v33 }
 0x2b9   : > { %v1101_v28 = vadd.f32 %v1100_v15, %v1080_v24  ;;  %v979_v30 = vpop.f32.mrf.mxu1  ;;  %v1121_v37 = vadd.f32 %v1120_v20, %v1079_v14  ;;  %v1139_v20 = vmax.f32 %v1137_v63, %v2203_v31  ;;  %v834_v14 = vpop.permute.xlu0 %833 }
 0x2ba   : > { %v1082_v38 = vsel %vm1050_vm6, %v2262_v26, 0.0  ;;  %v2276_v39 = vadd.f32 %v979_v30, %v819_v13  ;;  %v1160_v30 = vmax.f32 %v1158_v9, %v2222_v48 }
 0x2bb   : > { %v1102_v46 = vadd.f32 %v1101_v28, %v1082_v38  ;;  %v983_v49 = vpop.f32.mrf.mxu1  ;;  %v1122_v51 = vadd.f32 %v1121_v37, %v1081_v45  ;;  %v1159_v28 = vmax.f32 %v1157_v4, %v2209_v35  ;;  %v1018_v38 = vadd.s32 120, %v2121_v21 }
 0x2bc   : > { %v1083_v52 = vsel %vm1051_vm7, %v2276_v39, 0.0  ;;  %v2288_v55 = vadd.f32 %v983_v49, %v824_v40 }
 0x2bd   : > { %v985_v59 = vpop.f32.mrf.mxu1  ;;  %v1123_v50 = vadd.f32 %v1122_v51, %v1083_v52  ;;  %v1161_v45 = vmax.f32 %v1159_v28, %v2235_v61  ;;  %v1142_v52 = vmax.f32 %v1140_v32, %v2241_v2  ;;  %vm1058_vm14 = vcmp.eq.s32.totalorder %v1018_v38, %v2128_v29 }
 0x2be   : > { %v1084_v0 = vsel %vm1052_vm8, %v2288_v55, 0.0  ;;  %v2297_v60 = vadd.f32 %v985_v59, %v824_v40  ;;  %v1141_v40 = vmax.f32 %v1139_v20, %v2228_v53  ;;  %vm1059_vm15 = vcmp.eq.s32.totalorder %v1018_v38, %v2131_v33 }
 0x2bf   : > { %v1103_v10 = vadd.f32 %v1102_v46, %v1084_v0  ;;  %v987_v11 = vpop.f32.mrf.mxu1  ;;  %v1162_v46 = vmax.f32 %v1160_v30, %v2247_v6  ;;  %v1163_v0 = vmax.f32 %v1161_v45, %v2258_v17 }
 0x2c0   : > { %v1085_v13 = vsel %vm1053_vm9, %v2297_v60, 0.0  ;;  %v2303_v8 = vadd.f32 %v987_v11, %v829_v54  ;;  %v1143_v58 = vmax.f32 %v1141_v40, %v2262_v26 }
 0x2c1   : > { %v1124_v15 = vadd.f32 %v1123_v50, %v1085_v13  ;;  %v989_v19 = vpop.f32.mrf.mxu1  ;;  %v839_v50 = vpop.permute.xlu1 %838  ;;  %v1165_v62 = vmax.f32 %v1163_v0, %v2297_v60 }
 0x2c2   : > { %v1086_v24 = vsel %vm1054_vm10, %v2303_v8, 0.0  ;;  %v2310_v27 = vadd.f32 %v989_v19, %v829_v54  ;;  %v1164_v54 = vmax.f32 %v1162_v46, %v2276_v39  ;;  %v1145_v11 = vmax.f32 %v1143_v58, %v2303_v8 }
 0x2c3   : > { %v1104_v34 = vadd.f32 %v1103_v10, %v1086_v24  ;;  %v993_v37 = vpop.f32.mrf.mxu1  ;;  %v1144_v10 = vmax.f32 %v1142_v52, %v2288_v55 }
 0x2c4   : > { %v1087_v44 = vsel %vm1055_vm11, %v2310_v27, 0.0  ;;  %v2318_v23 = vadd.f32 %v993_v37, %v834_v14  ;;  %v1166_v19 = vmax.f32 %v1164_v54, %v2310_v27 }
 0x2c5   : > { %v1125_v49 = vadd.f32 %v1124_v15, %v1087_v44  ;;  %v995_v51 = vpop.f32.mrf.mxu1 }
 0x2c6   : > { %v1088_v59 = vsel %vm1056_vm12, %v2318_v23, 0.0  ;;  %v2328_v63 = vadd.f32 %v995_v51, %v834_v14  ;;  %v1146_v24 = vmax.f32 %v1144_v10, %v2318_v23 }
 0x2c7   : > { %v1105_v4 = vadd.f32 %v1104_v34, %v1088_v59  ;;  %v997_v9 = vpop.f32.mrf.mxu1 }
 0x2c8   : > { %v1089_v13 = vsel %vm1057_vm13, %v2328_v63, 0.0  ;;  %v2336_v15 = vadd.f32 %v997_v9, %v839_v50  ;;  %v1167_v34 = vmax.f32 %v1165_v62, %v2328_v63 }
 0x2c9   : > { %v1126_v3 = vadd.f32 %v1125_v49, %v1089_v13  ;;  %v999_v20 = vpop.f32.mrf.mxu1 }
 0x2ca   : > { %v1090_v29 = vsel %vm1058_vm14, %v2336_v15, 0.0  ;;  %v1147_v14 = vmax.f32 %v1145_v11, %v2336_v15  ;;  %v2344_v28 = vadd.f32 %v999_v20, %v839_v50 }
 0x2cb   : > { %v2346_v30 = vadd.f32 %v1105_v4, %v1090_v29 }
 0x2cc   : > { %v1148_v37 = vmax.f32 %v1146_v24, %v1147_v14  ;;  %v1091_v32 = vsel %vm1059_vm15, %v2344_v28, 0.0  ;;  %v1168_v40 = vmax.f32 %v1166_v19, %v2344_v28 }
 0x2cd   : > { %v2351_v44 = vadd.f32 %v1126_v3, %v1091_v32 }
 0x2ce   : > { %v1149_v33 = vrot.slane %v1148_v37, 4  ;;  %v1169_v38 = vmax.f32 %v1167_v34, %v1168_v40 }
 0x2d0   : > { %v1150_v45 = vmax.f32 %v1148_v37, %v1149_v33  ;;  %v1170_v46 = vrot.slane %v1169_v38, 4 }
 0x2d2   : > { %v1151_v49 = vrot.slane %v1150_v45, 2  ;;  %v1171_v52 = vmax.f32 %v1169_v38, %v1170_v46 }
 0x2d4   : > { %v1152_v51 = vmax.f32 %v1150_v45, %v1151_v49  ;;  %v1172_v50 = vrot.slane %v1171_v52, 2 }
 0x2d6   : > { %v1153_v58 = vrot.slane %v1152_v51, 1  ;;  %v1173_v9 = vmax.f32 %v1171_v52, %v1172_v50 }
 0x2d8   : > { %v2353_v59 = vmax.f32 %v1152_v51, %v1153_v58  ;;  %v1174_v3 = vrot.slane %v1173_v9, 1 }
 0x2da   : > { %v1176_v0 = vsub.f32 %v2133_v36, %v2353_v59  ;;  %v1178_v54 = vsub.f32 %v2141_v42, %v2353_v59  ;;  %v1180_v4 = vsub.f32 %v2155_v56, %v2353_v59  ;;  %v1182_v10 = vsub.f32 %v2171_v7, %v2353_v59 }
 0x2db   : > { %v1184_v62 = vsub.f32 %v2168_v5, %v2353_v59  ;;  %v1186_v36 = vsub.f32 %v2178_v12, %v2353_v59  ;;  %v1188_v56 = vsub.f32 %v2192_v22, %v2353_v59  ;;  %v2369_v24 = vmax.f32 %v1173_v9, %v1174_v3 }
 0x2dc   : > { %v1208_v11 = vmul.f32 1.442695, %v1176_v0  ;;  %v1212_v13 = vmul.f32 1.442695, %v1178_v54  ;;  %v1216_v19 = vmul.f32 1.442695, %v1180_v4  ;;  %v1190_v7 = vsub.f32 %v2203_v31, %v2353_v59 }
 0x2dd   : > { %v1220_v42 = vmul.f32 1.442695, %v1182_v10  ;;  %v1224_v20 = vmul.f32 1.442695, %v1184_v62  ;;  %v1228_v5 = vmul.f32 1.442695, %v1186_v36  ;;  %v1192_v29 = vsub.f32 %v2216_v43, %v2353_v59 }
 0x2de   : > { %1702 = vpow2.f32 %v1208_v11  ;;  %v1194_v12 = vsub.f32 %v2228_v53, %v2353_v59  ;;  %v1232_v14 = vmul.f32 1.442695, %v1188_v56  ;;  %v1177_v22 = vsub.f32 %v2139_v41, %v2369_v24 }
 0x2df   : > { %1704 = vpow2.f32 %v1212_v13  ;;  %v1236_v34 = vmul.f32 1.442695, %v1190_v7  ;;  %v1179_v37 = vsub.f32 %v2148_v47, %v2369_v24  ;;  %v1196_v31 = vsub.f32 %v2241_v2, %v2353_v59 }
 0x2e0   : > { %1706 = vpow2.f32 %v1216_v19  ;;  %v1240_v32 = vmul.f32 1.442695, %v1192_v29  ;;  %v1244_v40 = vmul.f32 1.442695, %v1194_v12  ;;  %v1181_v43 = vsub.f32 %v2163_v1, %v2369_v24 }
 0x2e1   : > { %1708 = vpow2.f32 %v1220_v42  ;;  %v1198_v53 = vsub.f32 %v2262_v26, %v2353_v59  ;;  %v1210_v33 = vmul.f32 1.442695, %v1177_v22  ;;  %v1183_v41 = vsub.f32 %v2187_v18, %v2369_v24 }
 0x2e2   : > { %1710 = vpow2.f32 %v1224_v20  ;;  %v1214_v45 = vmul.f32 1.442695, %v1179_v37  ;;  %v1200_v2 = vsub.f32 %v2288_v55, %v2353_v59  ;;  %v1248_v46 = vmul.f32 1.442695, %v1196_v31 }
 0x2e3   : > { %1712 = vpow2.f32 %v1228_v5  ;;  %v1185_v1 = vsub.f32 %v2183_v16, %v2369_v24  ;;  %v1218_v51 = vmul.f32 1.442695, %v1181_v43  ;;  %v1202_v52 = vsub.f32 %v2303_v8, %v2353_v59 }
 0x2e4   : > { %1714 = vpow2.f32 %v1232_v14  ;;  %v1252_v58 = vmul.f32 1.442695, %v1198_v53  ;;  %v1187_v50 = vsub.f32 %v2196_v25, %v2369_v24  ;;  %v1222_v55 = vmul.f32 1.442695, %v1183_v41 }
 0x2e5   : > { %1716 = vpow2.f32 %v1236_v34  ;;  %v1204_v54 = vsub.f32 %v2318_v23, %v2353_v59  ;;  %v1256_v4 = vmul.f32 1.442695, %v1200_v2  ;;  %v1189_v9 = vsub.f32 %v2209_v35, %v2369_v24 }
 0x2e6   : > { %1718 = vpow2.f32 %v1240_v32  ;;  %v1226_v8 = vmul.f32 1.442695, %v1185_v1  ;;  %v1206_v11 = vsub.f32 %v2336_v15, %v2353_v59  ;;  %v1260_v25 = vmul.f32 1.442695, %v1202_v52 }
 0x2e7   : > { %1720 = vpow2.f32 %v1244_v40  ;;  %v1191_v62 = vsub.f32 %v2222_v48, %v2369_v24  ;;  %v1230_v23 = vmul.f32 1.442695, %v1187_v50  ;;  %v1264_v3 = vmul.f32 1.442695, %v1204_v54 }
 0x2e8   : > { %1722 = vpow2.f32 %v1210_v33  ;;  %v1193_v35 = vsub.f32 %v2235_v61, %v2369_v24  ;;  %v1234_v42 = vmul.f32 1.442695, %v1189_v9  ;;  %v1268_v15 = vmul.f32 1.442695, %v1206_v11 }
 0x2e9   : > { %1724 = vpow2.f32 %v1214_v45  ;;  %v1195_v7 = vsub.f32 %v2247_v6, %v2369_v24  ;;  %v1238_v48 = vmul.f32 1.442695, %v1191_v62  ;;  %v1197_v14 = vsub.f32 %v2258_v17, %v2369_v24 }
 0x2ea   : > { %1726 = vpow2.f32 %v1248_v46  ;;  %v1242_v61 = vmul.f32 1.442695, %v1193_v35  ;;  %v1199_v31 = vsub.f32 %v2276_v39, %v2369_v24  ;;  %v1201_v40 = vsub.f32 %v2297_v60, %v2369_v24 }
 0x2eb   : > { %v1703_v38 = vpop.eup %1702  ;;  %1728 = vpow2.f32 %v1218_v51  ;;  %v1246_v6 = vmul.f32 1.442695, %v1195_v7  ;;  %v1250_v33 = vmul.f32 1.442695, %v1197_v14  ;;  %v1203_v41 = vsub.f32 %v2310_v27, %v2369_v24 }
 0x2ec   : > { %v1705_v47 = vpop.eup %1704  ;;  %1730 = vpow2.f32 %v1252_v58  ;;  %v1254_v2 = vmul.f32 1.442695, %v1199_v31  ;;  %v1258_v51 = vmul.f32 1.442695, %v1201_v40  ;;  %v1207_v58 = vsub.f32 %v2344_v28, %v2369_v24 }
 0x2ed   : > { %v1272_v49 = vadd.f32 %v1705_v47, %v1703_v38  ;;  %v1707_v26 = vpop.eup %1706  ;;  %1732 = vpow2.f32 %v1222_v55  ;;  %v1262_v50 = vmul.f32 1.442695, %v1203_v41 }
 0x2ee   : > { %v1709_v0 = vpop.eup %1708  ;;  %1734 = vpow2.f32 %v1256_v4  ;;  %v1270_v11 = vmul.f32 1.442695, %v1207_v58 }
 0x2ef   : > { %v1273_v18 = vadd.f32 %v1707_v26, %v1272_v49  ;;  %v1711_v10 = vpop.eup %1710  ;;  %1736 = vpow2.f32 %v1226_v8  ;;  %v1205_v49 = vsub.f32 %v2328_v63, %v2369_v24 }
 0x2f0   : > { %v1713_v19 = vpop.eup %1712  ;;  %1738 = vpow2.f32 %v1260_v25 }
 0x2f1   : > { %v1274_v16 = vadd.f32 %v1709_v0, %v1273_v18  ;;  %v1715_v56 = vpop.eup %1714  ;;  %1740 = vpow2.f32 %v1230_v23 }
 0x2f2   : > { %v1717_v5 = vpop.eup %1716  ;;  %1742 = vpow2.f32 %v1264_v3 }
 0x2f3   : > { %v1275_v13 = vadd.f32 %v1711_v10, %v1274_v16  ;;  %v1719_v29 = vpop.eup %1718  ;;  %1744 = vpow2.f32 %v1234_v42  ;;  %v1266_v16 = vmul.f32 1.442695, %v1205_v49 }
 0x2f4   : > { %v1721_v22 = vpop.eup %1720  ;;  %1746 = vpow2.f32 %v1268_v15 }
 0x2f5   : > { %v1276_v36 = vadd.f32 %v1713_v19, %v1275_v13  ;;  %v1723_v34 = vpop.eup %1722  ;;  %1748 = vpow2.f32 %v1238_v48 }
 0x2f6   : > { %v1725_v32 = vpop.eup %1724  ;;  %1750 = vpow2.f32 %v1242_v61 }
 0x2f7   : > { %v1277_v20 = vadd.f32 %v1715_v56, %v1276_v36  ;;  %v1727_v43 = vpop.eup %1726  ;;  %v1293_v17 = vadd.f32 %v1725_v32, %v1723_v34  ;;  %1752 = vpow2.f32 %v1246_v6 }
 0x2f8   : > { %v1729_v38 = vpop.eup %1728  ;;  %1754 = vpow2.f32 %v1250_v33 }
 0x2f9   : > { %v1278_v12 = vadd.f32 %v1717_v5, %v1277_v20  ;;  %v1731_v45 = vpop.eup %1730  ;;  %v1294_v39 = vadd.f32 %v1729_v38, %v1293_v17  ;;  %1756 = vpow2.f32 %v1254_v2  ;;  %v1107_v17 = vrot.slane %v2346_v30, 4 }
 0x2fa   : > { %v1733_v46 = vpop.eup %1732  ;;  %1758 = vpow2.f32 %v1258_v51  ;;  %v1128_v38 = vrot.slane %v2351_v44, 4 }
 0x2fb   : > { %v1279_v37 = vadd.f32 %v1719_v29, %v1278_v12  ;;  %v1735_v1 = vpop.eup %1734  ;;  %v1295_v26 = vadd.f32 %v1733_v46, %v1294_v39  ;;  %1760 = vpow2.f32 %v1262_v50 }
 0x2fc   : > { %v1737_v52 = vpop.eup %1736  ;;  %1762 = vpow2.f32 %v1266_v16  ;;  %v1129_v2 = vadd.f32 %v1128_v38, %v2351_v44 }
 0x2fd   : > { %v1280_v53 = vadd.f32 %v1721_v22, %v1279_v37  ;;  %v1739_v18 = vpop.eup %1738  ;;  %v1296_v55 = vadd.f32 %v1737_v52, %v1295_v26  ;;  %1764 = vpow2.f32 %v1270_v11  ;;  %v1834_v26 = vmov 1966171168  }
 0x2fe   : > { %v1741_v0 = vpop.eup %1740  ;;  %v1130_v46 = vrot.slane %v1129_v2, 2  ;;  %v1326_v52 = vunpack.c.l.s4 %v1834_v26 }
 0x2ff   : > { %v1281_v47 = vadd.f32 %v1727_v43, %v1280_v53  ;;  %v1743_v54 = vpop.eup %1742  ;;  %v1297_v63 = vadd.f32 %v1741_v0, %v1296_v55 }
 0x300   : > { %v1745_v9 = vpop.eup %1744 }
 0x301   : > { %v1282_v60 = vadd.f32 %v1731_v45, %v1281_v47  ;;  %v1747_v8 = vpop.eup %1746  ;;  %v1298_v25 = vadd.f32 %v1745_v9, %v1297_v63  ;;  %v1108_v47 = vadd.f32 %v1107_v17, %v2346_v30  ;;  %v1327_v30 = vunpack.c.0.s8 %v1326_v52 }
 0x302   : > { %v1749_v13 = vpop.eup %1748 }
 0x303   : > { %v1283_v27 = vadd.f32 %v1735_v1, %v1282_v60  ;;  %v1299_v28 = vadd.f32 %v1749_v13, %v1298_v25  ;;  %v1751_v23 = vpop.eup %1750  ;;  %v1109_v39 = vrot.slane %v1108_v47, 2  ;;  %v1131_v60 = vadd.f32 %v1130_v46, %v1129_v2 }
 0x304   : > { %v1753_v36 = vpop.eup %1752  ;;  %v1330_v63 = vsub.s32 %v1327_v30, %v2121_v21 }
 0x305   : > { %v1284_v4 = vadd.f32 %v1739_v18, %v1283_v27  ;;  %v1300_v3 = vadd.f32 %v1751_v23, %v1299_v28  ;;  %v1755_v56 = vpop.eup %1754  ;;  %v1110_v1 = vadd.f32 %v1109_v39, %v1108_v47  ;;  %v1132_v18 = vrot.slane %v1131_v60, 1 }
 0x306   : > { %v1757_v20 = vpop.eup %1756 }
 0x307   : > { %v1285_v10 = vadd.f32 %v1743_v54, %v1284_v4  ;;  %v1301_v42 = vadd.f32 %v1753_v36, %v1300_v3  ;;  %v1759_v5 = vpop.eup %1758  ;;  %v1111_v58 = vrot.slane %v1110_v1, 1  ;;  %v1133_v0 = vadd.f32 %v1132_v18, %v1131_v60 }
 0x308   : > { %v1761_v12 = vpop.eup %1760 }
 0x309   : > { %v1286_v62 = vadd.f32 %v1747_v8, %v1285_v10  ;;  %v1302_v15 = vadd.f32 %v1755_v56, %v1301_v42  ;;  %v1763_v22 = vpop.eup %1762  ;;  %v1112_v44 = vadd.f32 %v1111_v58, %v1110_v1 }
 0x30a   : > { %v1765_v37 = vpop.eup %1764 }
 0x30b   : > { %v1287_v19 = vrot.slane %v1286_v62, 4  ;;  %v1303_v48 = vadd.f32 %v1757_v20, %v1302_v15 }
 0x30d   : > { %v1288_v35 = vadd.f32 %v1287_v19, %v1286_v62  ;;  %v1304_v29 = vadd.f32 %v1759_v5, %v1303_v48 }
 0x30f   : > { %v1289_v7 = vrot.slane %v1288_v35, 2  ;;  %v1305_v14 = vadd.f32 %v1761_v12, %v1304_v29 }
 0x311   : > { %v1290_v61 = vadd.f32 %v1289_v7, %v1288_v35  ;;  %v1306_v34 = vadd.f32 %v1763_v22, %v1305_v14 }
 0x313   : > { %v1307_v31 = vadd.f32 %v1765_v37, %v1306_v34  ;;  %v1291_v6 = vrot.slane %v1290_v61, 1 }
 0x315   : > { %v1308_v32 = vrot.slane %v1307_v31, 4  ;;  %v1292_v43 = vadd.f32 %v1291_v6, %v1290_v61 }
 0x317   : > { %v1309_v40 = vadd.f32 %v1308_v32, %v1307_v31  ;;  %1766 = vlog2.f32 %v1292_v43 }
 0x319   : > { %v1310_v53 = vrot.slane %v1309_v40, 2 }
 0x31b   : > { %v1311_v33 = vadd.f32 %v1310_v53, %v1309_v40 }
 0x31d   : > { %v1312_v41 = vrot.slane %v1311_v33, 1 }
 0x31f   : > { %v1313_v45 = vadd.f32 %v1312_v41, %v1311_v33 }
 0x321   : > { %1768 = vlog2.f32 %v1313_v45 }
 0x324   : > { %v1767_v49 = vpop.eup %1766 }
 0x325   : > { %v1315_v51 = vmul.f32 0.6931472, %v1767_v49 }
 0x327   : > { %v1318_v55 = vadd.f32 %v1315_v51, %v2353_v59 }
 0x329   : > { %v1320_v4 = vsub.f32 %v1318_v55, %v1112_v44 }
 0x32e   : > { %v1769_v27 = vpop.eup %1768 }
 0x32f   : > { %v1317_v50 = vmul.f32 0.6931472, %v1769_v27 }
 0x331   : > { %v1319_v54 = vadd.f32 %v1317_v50, %v2369_v24 }
 0x333   : > { %v1321_v16 = vsub.f32 %v1319_v54, %v1133_v0 }
 0x335   : > { %v1324_v9 = vcombine.low %v1320_v4, %v1321_v16 }
 0x337   : > { %v1331_v8 = vrot.slane %v1324_v9, %v1330_v63 }
 0x339   : > { %v1338_v10 = vrot.slane %v1331_v8, %v1330_v63 }
 0x33b   : > { %1344 = vst.msk [vmem:[%s232_s10] sm:$0x3] %vm1342_vm0, %v1338_v10 }
 0x33c   : > { %1783 = shalt.err (!%p1780_p4)
}
 0x33d   : > { %s1784_s16 = scalar_lea.hbm %s1358_s9, 32  ;;  %s1788_s23 = scalar_lea.hbm %s2468_s5, 64 }
 0x33e   : > { %p1785_p7 = scmp.ne.s32.totalorder %s1358_s9, %s1784_s16  ;;  %p1789_p10 = scmp.lt.s32.totalorder %s1358_s9, %s2468_s5 }
 0x33f   : > { %p1790_p11 = scmp.lt.s32.totalorder %s1788_s23, %s1784_s16 }
 0x340   : > { %p1786_p8 = pnand %p1785_p7, %p1904_p5 }
 0x341   : > { %p1791_p12 = por %p1790_p11, %p1789_p10 }
 0x342   : > { %p1787_p9 = pneg %p1786_p8 }
 0x344   : > { %p1792_p13 = pnand %p1791_p12, %p1787_p9 }
 0x346   : > { %1795 = shalt.err (!%p1792_p13)
}
 0x347   : > { %1642 = dma.vmem_to_hbm [thread:$0]  (%p1904_p5), %s1361_s6, 32, %s1358_s9, %s1346_s11  }
 0x348 PF: > { %p1648_p0 = scmp.ge.s32.totalorder %s1830_s21, 2  ;;  %s1372_s26 = sand.u32 1, %s1818_s18  }
 0x349   : > { %s1373_s10 = scalar_lea.sflag [#allocation3], %s1372_s26 }
 0x34a   : > { %p1645_p1 = pnand %p1648_p0, %p1908_p6 }
 0x34c   : > { %p1646_p2 = pneg %p1645_p1 }
 0x34e   : > { %1813 = dma.done.wait (%p1646_p2), %s1373_s10, 32  }
 0x34f   : > { %1815 = vsyncadd (%p1646_p2), %s1373_s10, 4294967264  ;;  %p15_p3 = scmp.ge.s32.totalorder %s1891_s24, 4   ;;  %s2471_s18 = smov %s1822_s19 }
 0x350   : > { %s2472_s19 = smov %s1826_s20  ;;  %s2473_s20 = smov %s1902_s27 }
 0x351   : > { %s2474_s21 = smov %s1891_s24  ;;  %17 = sbr.rel (!%p15_p3) target bundleno = 3 (0x3), region = 78 }
 0x356   :  { %1378 = vsyncpa [#allocation3], 1 }
 0x357   :  { %1380 = vsyncpa [#allocation3 + $0x1], 1 }

</bundles_post_ra>
